<compile_context>
chip_gen: v7x
topology: tpu7x:2x2x1
jax: 0.10.0
libtpu: 0.0.40
codegen_flags: <defaults>
</compile_context>

<pallas_src>
import functools
import numpy as np
import jax
import jax.numpy as jnp
from jax.experimental import pallas as pl
from jax.experimental.pallas import tpu as pltpu

# Target node rows per packed block (>=128; ~256 fills the v6e/v7x 256x256 MXU).
_BLOCK_ROW_TARGET = 256


def _round_up(v, m):
    return ((int(v) + m - 1) // m) * m


def _vmem_cap_bytes():
    try:
        return int(pltpu.get_tpu_info().vmem_capacity_bytes)
    except Exception:
        return 64 << 20  # conservative (v7x per-TensorCore VMEM)


# --------------------------------------------------------------------------- #
# Kernel
# --------------------------------------------------------------------------- #
def _make_kernel(use_proj: bool, xw_first: bool):
    """One grid step processes one packed block of graphs."""

    def kernel(x_ref, apI_ref, m_ref, mask_ref, exp_ref, ea_ref, *rest):
        if use_proj:
            Wp1_ref, bp1_ref = rest[:2]
            rest = rest[2:]
        (W1_ref, We_ref, be_ref, Wn1_ref, bn1_ref, Wn2_ref, bn2_ref,
         Wfc_ref, bfc_ref, out_ref) = rest

        f32, bf16 = jnp.float32, jnp.bfloat16
        x = x_ref[0]               # (NP, Fp)  f32
        apI = apI_ref[0]           # (NP, NP)  bf16  (A + I, exact small ints)
        mask = mask_ref[0]         # (GB, NP)  f32   rows: 1/|V_g| on graph g's nodes
        expand = exp_ref[0]        # (NP, GB)  f32   binary node->graph membership

        # ---- conv1: (I + A) @ x, plus per-graph (virtual-node) mean ----------
        if xw_first:
            # Fp > Hp: transform first so the dominant NP x NP matmul is Hp wide.
            y = jnp.dot(x, W1_ref[...], preferred_element_type=f32)        # (NP,Hp)
            out1 = jnp.dot(apI, y.astype(bf16), preferred_element_type=f32)
        else:
            out1 = jnp.dot(apI, x.astype(bf16), preferred_element_type=f32)  # (NP,Fp)
        vmsg = jnp.dot(mask, out1, preferred_element_type=f32)             # (GB, .)
        out1 = out1 + jnp.dot(expand, vmsg, preferred_element_type=f32)
        if xw_first:
            h = jnp.maximum(out1, 0.0)
        else:
            h = jnp.maximum(jnp.dot(out1, W1_ref[...],
                                    preferred_element_type=f32), 0.0)      # (NP,Hp)

        # ---- first residual (proj1 or identity, chosen at build time) --------
        if use_proj:
            resid = jnp.dot(x, Wp1_ref[...],
                            preferred_element_type=f32) + bp1_ref[...]
        else:
            resid = x
        h = h + resid                                                       # (NP,Hp)

        # ---- conv2 (GINE): agg = A@h + M@edge_msg = (A+I)@h - h + M@edge_msg -
        edge_msg = jnp.dot(ea_ref[0], We_ref[...],
                           preferred_element_type=f32) + be_ref[...]        # (EP,Hp)
        hb = h.astype(bf16)
        agg = (jnp.dot(apI, hb, preferred_element_type=f32) - hb.astype(f32)
               + jnp.dot(m_ref[0], edge_msg.astype(bf16),
                         preferred_element_type=f32))                       # (NP,Hp)
        z = jnp.maximum(jnp.dot(agg, Wn1_ref[...],
                                preferred_element_type=f32) + bn1_ref[...], 0.0)
        z = jnp.dot(z, Wn2_ref[...], preferred_element_type=f32) + bn2_ref[...]
        h = z + h                                                           # 2nd resid

        # ---- readout: per-graph mean + fc (lane-dense padded output) ---------
        gmean = jnp.dot(mask, h, preferred_element_type=f32)                # (GB,Hp)
        out_ref[0] = jnp.dot(gmean, Wfc_ref[...],
                             preferred_element_type=f32) + bfc_ref[...]

    return kernel


@functools.lru_cache(maxsize=None)
def _build_call(nb, NP, EP, GBmax, Fp, EAp, Hp, Op, use_proj, xw_first):
    def blk(shape):
        return pl.BlockSpec((1,) + shape[1:], lambda g: (g, 0, 0))

    # Constant-index weight blocks: single-buffer them when they are large
    # (matters under v7x's 64 MiB VMEM); at Hp=128 double buffering is harmless.
    w_mode = pl.Buffered(1) if Hp >= 512 else None

    def wspec(shape):
        n = len(shape)
        if w_mode is None:
            return pl.BlockSpec(shape, lambda g, n=n: (0,) * n)
        return pl.BlockSpec(shape, lambda g, n=n: (0,) * n, pipeline_mode=w_mode)

    in_specs = [blk((nb, NP, Fp)),        # x
                blk((nb, NP, NP)),        # A + I          (bf16)
                blk((nb, NP, EP)),        # M incidence    (bf16)
                blk((nb, GBmax, NP)),     # mean mask      (f32)
                blk((nb, NP, GBmax)),     # expansion      (f32)
                blk((nb, EP, EAp))]       # edge_attr
    if use_proj:
        in_specs += [wspec((Fp, Hp)), wspec((1, Hp))]
    in_specs += [wspec((Fp, Hp)), wspec((EAp, Hp)), wspec((1, Hp)),
                 wspec((Hp, Hp)), wspec((1, Hp)),
                 wspec((Hp, Hp)), wspec((1, Hp)),
                 wspec((Hp, Op)), wspec((1, Op))]

    # Per-step resident VMEM: double-buffered per-block inputs + output block
    # + weight buffers (block footprint, NOT whole HBM arrays).
    per_step = (NP * Fp * 4 + NP * NP * 2 + NP * EP * 2
                + GBmax * NP * 4 + NP * GBmax * 4 + EP * EAp * 4
                + GBmax * Op * 4)
    w_bytes = (Fp * Hp + EAp * Hp + Hp + 2 * (Hp * Hp + Hp) + Hp * Op + Op) * 4
    if use_proj:
        w_bytes += (Fp * Hp + Hp) * 4
    w_buf = 1 if Hp >= 512 else 2
    resident = 2 * per_step + w_buf * w_bytes
    hard_cap = int(0.75 * _vmem_cap_bytes())
    vmem_limit = int(min(hard_cap, max(16 << 20, resident + (8 << 20))))

    return pl.pallas_call(
        _make_kernel(use_proj, xw_first),
        out_shape=jax.ShapeDtypeStruct((nb, GBmax, Op), jnp.float32),
        grid_spec=pltpu.PrefetchScalarGridSpec(
            num_scalar_prefetch=0,
            grid=(nb,),
            in_specs=in_specs,
            out_specs=pl.BlockSpec((1, GBmax, Op), lambda g: (g, 0, 0)),
        ),
        compiler_params=pltpu.CompilerParams(
            dimension_semantics=("parallel",),
            vmem_limit_bytes=vmem_limit,
        ),
    )


# --------------------------------------------------------------------------- #
# Host-side packing (run once per batch structure) and weight padding
# --------------------------------------------------------------------------- #
def pack_graph_batch(x, edge_index, edge_attr, batch, num_graphs, hidden):
    """Pack a PyG-style batch into block-diagonal super-blocks (numpy, host)."""
    x_np = np.asarray(x, np.float32)
    ea_np = np.asarray(edge_attr, np.float32)
    b = np.asarray(batch, np.int64)
    src = np.asarray(edge_index[0], np.int64)
    dst = np.asarray(edge_index[1], np.int64)

    N, F_in = x_np.shape
    E = int(src.shape[0])
    ead = ea_np.shape[1] if ea_np.ndim == 2 else 0
    G = int(num_graphs)
    assert E == 0 or bool(np.all(b[src] == b[dst])), "cross-graph edges unsupported"

    Fp = _round_up(max(F_in, 1), 128)
    Hp = _round_up(hidden, 128)
    EAp = _round_up(max(ead, 1), 128)

    counts = np.bincount(b, minlength=G).astype(np.int64)
    e_graph = b[src] if E > 0 else np.zeros(0, np.int64)
    e_counts = np.bincount(e_graph, minlength=G).astype(np.int64)

    # --- pack graphs into blocks of ~_BLOCK_ROW_TARGET node rows (LPT) --------
    cap = max(_BLOCK_ROW_TARGET, _round_up(int(counts.max()), 128))
    nb = int(np.ceil(counts.sum() / cap))
    if G >= 2:
        nb = max(nb, 2)              # keep both v7x TensorCores busy
    nb = max(1, min(nb, G))

    block_of = np.zeros(G, np.int64)
    loads = np.zeros(nb, np.int64)
    for g in np.argsort(-counts, kind="stable"):
        bl = int(np.argmin(loads))
        block_of[g] = bl
        loads[bl] += counts[g]

    glocal = np.zeros(G, np.int64)
    node_off = np.zeros(G, np.int64)
    edge_off = np.zeros(G, np.int64)
    gb_cnt = np.zeros(nb, np.int64)
    n_load = np.zeros(nb, np.int64)
    e_load = np.zeros(nb, np.int64)
    for g in range(G):
        bl = block_of[g]
        glocal[g] = gb_cnt[bl]; gb_cnt[bl] += 1
        node_off[g] = n_load[bl]; n_load[bl] += counts[g]
        edge_off[g] = e_load[bl]; e_load[bl] += e_counts[g]

    NP = max(128, _round_up(int(n_load.max()), 128))
    EP = max(128, _round_up(int(max(e_load.max(), 1)), 128))
    GBmax = max(8, _round_up(int(gb_cnt.max()), 8))

    # --- node / edge placement inside each block -------------------------------
    order = np.argsort(b, kind="stable")
    offs = np.concatenate([[0], np.cumsum(counts)])
    node_local = np.empty(N, np.int64)
    node_local[order] = np.arange(N) - offs[b[order]]
    node_row = node_off[b] + node_local
    node_blk = block_of[b]

    if E > 0:
        e_order = np.argsort(e_graph, kind="stable")
        e_offs = np.concatenate([[0], np.cumsum(e_counts)])
        e_local = np.empty(E, np.int64)
        e_local[e_order] = np.arange(E) - e_offs[e_graph[e_order]]
        e_row = edge_off[e_graph] + e_local
        e_blk = block_of[e_graph]
    else:
        e_row = np.zeros(0, np.int64)
        e_blk = np.zeros(0, np.int64)

    # --- dense per-block structural tensors ------------------------------------
    A = np.zeros((nb, NP, NP), np.float32)
    if E > 0:
        np.add.at(A, (e_blk, node_row[dst], node_row[src]), 1.0)
    assert A.max() < 256, "edge multiplicity >= 256 not exact in bf16"
    apI = A + np.eye(NP, dtype=np.float32)[None]                 # (A + I)
    M = np.zeros((nb, NP, EP), np.float32)
    if E > 0:
        M[e_blk, node_row[dst], e_row] = 1.0

    x_blk = np.zeros((nb, NP, Fp), np.float32)
    x_blk[node_blk, node_row, :F_in] = x_np
    ea_blk = np.zeros((nb, EP, EAp), np.float32)
    if E > 0 and ead > 0:
        ea_blk[e_blk, e_row, :ead] = ea_np
    mask = np.zeros((nb, GBmax, NP), np.float32)
    mask[node_blk, glocal[b], node_row] = 1.0 / np.maximum(counts[b], 1)
    expand = np.zeros((nb, NP, GBmax), np.float32)
    expand[node_blk, node_row, glocal[b]] = 1.0

    out_index = (block_of * GBmax + glocal).astype(np.int32)

    packed = dict(
        x=jnp.asarray(x_blk),
        apI=jnp.asarray(apI, dtype=jnp.bfloat16),   # bit-exact small ints
        M=jnp.asarray(M, dtype=jnp.bfloat16),
        mask=jnp.asarray(mask),
        expand=jnp.asarray(expand),
        ea=jnp.asarray(ea_blk),
        out_index=jnp.asarray(out_index),
    )
    meta = dict(nb=nb, NP=NP, EP=EP, GBmax=GBmax, Fp=Fp, Hp=Hp, EAp=EAp,
                F_in=F_in, hidden=hidden)
    return packed, meta


def _pad2(a, rows, cols):
    a = np.asarray(a, np.float32)
    out = np.zeros((rows, cols), np.float32)
    out[: a.shape[0], : a.shape[1]] = a
    return jnp.asarray(out)


def pad_params(params, meta):
    """Pad weights to lane-dense shapes (do once, cache across calls)."""
    Fp, Hp, EAp = meta["Fp"], meta["Hp"], meta["EAp"]
    out_features = params["Wfc"].shape[1]
    Op = _round_up(out_features, 128)
    use_proj = meta["F_in"] != meta["hidden"]
    w = []
    if use_proj:
        w += [_pad2(params["Wp1"], Fp, Hp), _pad2(params["bp1"], 1, Hp)]
    w += [_pad2(params["W1"], Fp, Hp),
          _pad2(params["We"], EAp, Hp), _pad2(params["be"], 1, Hp),
          _pad2(params["Wn1"], Hp, Hp), _pad2(params["bn1"], 1, Hp),
          _pad2(params["Wn2"], Hp, Hp), _pad2(params["bn2"], 1, Hp),
          _pad2(params["Wfc"], Hp, Op), _pad2(params["bfc"], 1, Op)]
    return w, Op, out_features, use_proj


def gnn_forward_packed(packed, meta, padded_w, Op, out_features, use_proj):
    xw_first = meta["Fp"] > meta["Hp"]
    call = _build_call(meta["nb"], meta["NP"], meta["EP"], meta["GBmax"],
                       meta["Fp"], meta["EAp"], meta["Hp"], Op,
                       use_proj, xw_first)
    out_blocks = call(packed["x"], packed["apI"], packed["M"],
                      packed["mask"], packed["expand"], packed["ea"], *padded_w)
    flat = out_blocks.reshape(meta["nb"] * meta["GBmax"], Op)
    return flat[packed["out_index"], :out_features]


def gnn_forward(x, edge_index, edge_attr, batch, num_graphs, params):
    """Convenience one-shot wrapper.  For repeated calls, hoist
    pack_graph_batch / pad_params out of the hot path and reuse them."""
    hidden = params["W1"].shape[1]
    packed, meta = pack_graph_batch(x, edge_index, edge_attr, batch,
                                    num_graphs, hidden)
    padded_w, Op, out_features, use_proj = pad_params(params, meta)
    return gnn_forward_packed(packed, meta, padded_w, Op, out_features, use_proj)


# --------------------------------------------------------------------------- #
# Plain-JAX reference mirroring the PyTorch forward
# --------------------------------------------------------------------------- #
def reference_forward(x, edge_index, edge_attr, batch, num_graphs, params):
    N, F_in = x.shape
    src, dst = edge_index[0], edge_index[1]
    hidden = params["W1"].shape[1]

    def scatter_add(vals, idx, size):
        return jnp.zeros((size, vals.shape[1]), vals.dtype).at[idx].add(vals)

    def scatter_mean(vals, idx, size):
        s = jnp.zeros((size, vals.shape[1]), vals.dtype).at[idx].add(vals)
        c = jnp.zeros((size, 1), vals.dtype).at[idx].add(1.0)
        return s / jnp.maximum(c, 1.0)

    # conv1 (GCN with virtual node)
    out = x + scatter_add(x[src], dst, N)
    vmsg = scatter_mean(out, batch, num_graphs)
    out = out + vmsg[batch]
    h = jax.nn.relu(out @ params["W1"])
    resid = x @ params["Wp1"] + params["bp1"] if F_in != hidden else x
    h = h + resid
    # conv2 (GINE)
    em = edge_attr @ params["We"] + params["be"]
    msgs = h[src] + em
    agg = scatter_add(msgs, dst, N)
    z = jax.nn.relu(agg @ params["Wn1"] + params["bn1"])
    z = z @ params["Wn2"] + params["bn2"]
    h = z + h
    # readout
    g = scatter_mean(h, batch, num_graphs)
    return g @ params["Wfc"] + params["bfc"]


def init_params(key, in_features, hidden, out_features, edge_attr_dim):
    ks = jax.random.split(key, 12)

    def kaiming(k, fan_in, shape):
        return jax.random.normal(k, shape, jnp.float32) * np.sqrt(2.0 / fan_in)

    def linear(kw, kb, fin, fout):
        bound = 1.0 / np.sqrt(fin)
        W = jax.random.uniform(kw, (fin, fout), jnp.float32, -bound, bound)
        b = jax.random.uniform(kb, (1, fout), jnp.float32, -bound, bound)
        return W, b

    W1 = kaiming(ks[0], in_features, (in_features, hidden))          # conv1.W
    Wp1, bp1 = linear(ks[1], ks[2], in_features, hidden)             # proj1
    We, be = linear(ks[3], ks[4], edge_attr_dim, hidden)             # conv2.edge_mlp
    Wn1, bn1 = linear(ks[5], ks[6], hidden, hidden)                  # conv2.node_mlp[0]
    Wn2, bn2 = linear(ks[7], ks[8], hidden, hidden)                  # conv2.node_mlp[2]
    Wfc, bfc = linear(ks[9], ks[10], hidden, out_features)           # fc
    return dict(W1=W1, Wp1=Wp1, bp1=bp1, We=We, be=be,
                Wn1=Wn1, bn1=bn1, Wn2=Wn2, bn2=bn2, Wfc=Wfc, bfc=bfc)


if __name__ == "__main__":
    # small deterministic problem
    N, E, G = 16, 32, 2
    in_features, hidden, out_features, edge_attr_dim = 8, 32, 4, 6

    key = jax.random.PRNGKey(0)
    kx, ke, ka, kp = jax.random.split(key, 4)

    x = jax.random.normal(kx, (N, in_features), jnp.float32)
    # nodes 0..7 -> graph 0, 8..15 -> graph 1
    batch = jnp.concatenate([jnp.zeros(N // 2, jnp.int32), jnp.ones(N // 2, jnp.int32)])
    # edges within each graph
    src0 = jax.random.randint(ke, (E // 2,), 0, N // 2)
    dst0 = jax.random.randint(jax.random.fold_in(ke, 1), (E // 2,), 0, N // 2)
    src1 = jax.random.randint(jax.random.fold_in(ke, 2), (E // 2,), N // 2, N)
    dst1 = jax.random.randint(jax.random.fold_in(ke, 3), (E // 2,), N // 2, N)
    edge_index = jnp.stack([jnp.concatenate([src0, src1]),
                            jnp.concatenate([dst0, dst1])]).astype(jnp.int32)
    edge_attr = jax.random.normal(ka, (E, edge_attr_dim), jnp.float32)

    params = init_params(kp, in_features, hidden, out_features, edge_attr_dim)

    out = gnn_forward(x, edge_index, edge_attr, batch, G, params)
    out = jax.block_until_ready(out)

    ref = reference_forward(x, edge_index, edge_attr, batch, G, params)
    # Aggregation matmuls run on the MXU in bf16 (native path, per perf review);
    # tolerance accounts for bf16 rounding of aggregated activations
    # (accumulation and all MLP/readout matmuls remain f32).
    np.testing.assert_allclose(np.asarray(out), np.asarray(ref), rtol=5e-2, atol=5e-2)

    print("KERNEL_OK")
</pallas_src>

<mosaic_0001>
module attributes {stable_mosaic.version = 11 : i64} {
  func.func @kernel(%arg0: i32, %arg1: memref<1x128x128xf32, #tpu.memory_space<vmem>>, %arg2: memref<1x128x128xbf16, #tpu.memory_space<vmem>>, %arg3: memref<1x128x128xbf16, #tpu.memory_space<vmem>>, %arg4: memref<1x8x128xf32, #tpu.memory_space<vmem>>, %arg5: memref<1x128x8xf32, #tpu.memory_space<vmem>>, %arg6: memref<1x128x128xf32, #tpu.memory_space<vmem>>, %arg7: memref<128x128xf32, #tpu.memory_space<vmem>>, %arg8: memref<1x128xf32, #tpu.memory_space<vmem>>, %arg9: memref<128x128xf32, #tpu.memory_space<vmem>>, %arg10: memref<128x128xf32, #tpu.memory_space<vmem>>, %arg11: memref<1x128xf32, #tpu.memory_space<vmem>>, %arg12: memref<128x128xf32, #tpu.memory_space<vmem>>, %arg13: memref<1x128xf32, #tpu.memory_space<vmem>>, %arg14: memref<128x128xf32, #tpu.memory_space<vmem>>, %arg15: memref<1x128xf32, #tpu.memory_space<vmem>>, %arg16: memref<128x128xf32, #tpu.memory_space<vmem>>, %arg17: memref<1x128xf32, #tpu.memory_space<vmem>>, %arg18: memref<1x8x128xf32, #tpu.memory_space<vmem>>) attributes {dimension_semantics = [#tpu.dimension_semantics<parallel>], iteration_bounds = array<i64: 2>, scalar_prefetch = 0 : i64, scratch_operands = 0 : i64, tpu.core_type = #tpu.core_type<tc>, window_params = [{transform_indices = @transform_0, window_bounds = array<i64: 1, 128, 128>}, {transform_indices = @transform_1, window_bounds = array<i64: 1, 128, 128>}, {transform_indices = @transform_2, window_bounds = array<i64: 1, 128, 128>}, {transform_indices = @transform_3, window_bounds = array<i64: 1, 8, 128>}, {transform_indices = @transform_4, window_bounds = array<i64: 1, 128, 8>}, {transform_indices = @transform_5, window_bounds = array<i64: 1, 128, 128>}, {pipeline_mode = #tpu.pipeline_mode<synchronous>, transform_indices = @transform_6, window_bounds = array<i64: 128, 128>}, {pipeline_mode = #tpu.pipeline_mode<synchronous>, transform_indices = @transform_7, window_bounds = array<i64: 1, 128>}, {pipeline_mode = #tpu.pipeline_mode<synchronous>, transform_indices = @transform_8, window_bounds = array<i64: 128, 128>}, {pipeline_mode = #tpu.pipeline_mode<synchronous>, transform_indices = @transform_9, window_bounds = array<i64: 128, 128>}, {pipeline_mode = #tpu.pipeline_mode<synchronous>, transform_indices = @transform_10, window_bounds = array<i64: 1, 128>}, {pipeline_mode = #tpu.pipeline_mode<synchronous>, transform_indices = @transform_11, window_bounds = array<i64: 128, 128>}, {pipeline_mode = #tpu.pipeline_mode<synchronous>, transform_indices = @transform_12, window_bounds = array<i64: 1, 128>}, {pipeline_mode = #tpu.pipeline_mode<synchronous>, transform_indices = @transform_13, window_bounds = array<i64: 128, 128>}, {pipeline_mode = #tpu.pipeline_mode<synchronous>, transform_indices = @transform_14, window_bounds = array<i64: 1, 128>}, {pipeline_mode = #tpu.pipeline_mode<synchronous>, transform_indices = @transform_15, window_bounds = array<i64: 128, 128>}, {pipeline_mode = #tpu.pipeline_mode<synchronous>, transform_indices = @transform_16, window_bounds = array<i64: 1, 128>}, {transform_indices = @transform_17, window_bounds = array<i64: 1, 8, 128>}]} {
    %c0 = arith.constant 0 : index
    %c0_0 = arith.constant 0 : index
    %c0_1 = arith.constant 0 : index
    %0 = vector.load %arg1[%c0, %c0_0, %c0_1] : memref<1x128x128xf32, #tpu.memory_space<vmem>>, vector<1x128x128xf32>
    %1 = vector.shape_cast %0 : vector<1x128x128xf32> to vector<128x128xf32>
    %c0_2 = arith.constant 0 : index
    %c0_3 = arith.constant 0 : index
    %c0_4 = arith.constant 0 : index
    %2 = vector.load %arg2[%c0_2, %c0_3, %c0_4] : memref<1x128x128xbf16, #tpu.memory_space<vmem>>, vector<1x128x128xbf16>
    %3 = vector.shape_cast %2 : vector<1x128x128xbf16> to vector<128x128xbf16>
    %c0_5 = arith.constant 0 : index
    %c0_6 = arith.constant 0 : index
    %c0_7 = arith.constant 0 : index
    %4 = vector.load %arg4[%c0_5, %c0_6, %c0_7] : memref<1x8x128xf32, #tpu.memory_space<vmem>>, vector<1x8x128xf32>
    %5 = vector.shape_cast %4 : vector<1x8x128xf32> to vector<8x128xf32>
    %c0_8 = arith.constant 0 : index
    %c0_9 = arith.constant 0 : index
    %c0_10 = arith.constant 0 : index
    %6 = vector.load %arg5[%c0_8, %c0_9, %c0_10] : memref<1x128x8xf32, #tpu.memory_space<vmem>>, vector<1x128x8xf32>
    %7 = vector.shape_cast %6 : vector<1x128x8xf32> to vector<128x8xf32>
    %8 = arith.truncf %1 : vector<128x128xf32> to vector<128x128xbf16>
    %cst = arith.constant dense<0.000000e+00> : vector<128x128xf32>
    %9 = tpu.matmul %3, %8, %cst {dimension_numbers = #tpu.dot_dimension_numbers<[1], [0], [0], [1], [0, 0, 1, 1], [], []>} : vector<128x128xbf16>, vector<128x128xbf16>, vector<128x128xf32> -> vector<128x128xf32>
    %cst_11 = arith.constant dense<0.000000e+00> : vector<8x128xf32>
    %10 = tpu.matmul %5, %9, %cst_11 {dimension_numbers = #tpu.dot_dimension_numbers<[1], [0], [0], [1], [0, 0, 1, 1], [], []>} : vector<8x128xf32>, vector<128x128xf32>, vector<8x128xf32> -> vector<8x128xf32>
    %cst_12 = arith.constant dense<0.000000e+00> : vector<128x128xf32>
    %11 = tpu.matmul %7, %10, %cst_12 {dimension_numbers = #tpu.dot_dimension_numbers<[1], [0], [0], [1], [0, 0, 1, 1], [], []>} : vector<128x8xf32>, vector<8x128xf32>, vector<128x128xf32> -> vector<128x128xf32>
    %12 = arith.addf %9, %11 : vector<128x128xf32>
    %c0_13 = arith.constant 0 : index
    %c0_14 = arith.constant 0 : index
    %13 = vector.load %arg9[%c0_13, %c0_14] : memref<128x128xf32, #tpu.memory_space<vmem>>, vector<128x128xf32>
    %cst_15 = arith.constant dense<0.000000e+00> : vector<128x128xf32>
    %14 = tpu.matmul %12, %13, %cst_15 {dimension_numbers = #tpu.dot_dimension_numbers<[1], [0], [0], [1], [0, 0, 1, 1], [], []>} : vector<128x128xf32>, vector<128x128xf32>, vector<128x128xf32> -> vector<128x128xf32>
    %cst_16 = arith.constant 0.000000e+00 : f32
    %15 = vector.broadcast %cst_16 : f32 to vector<128x128xf32>
    %16 = arith.maximumf %14, %15 : vector<128x128xf32>
    %c0_17 = arith.constant 0 : index
    %c0_18 = arith.constant 0 : index
    %17 = vector.load %arg7[%c0_17, %c0_18] : memref<128x128xf32, #tpu.memory_space<vmem>>, vector<128x128xf32>
    %cst_19 = arith.constant dense<0.000000e+00> : vector<128x128xf32>
    %18 = tpu.matmul %1, %17, %cst_19 {dimension_numbers = #tpu.dot_dimension_numbers<[1], [0], [0], [1], [0, 0, 1, 1], [], []>} : vector<128x128xf32>, vector<128x128xf32>, vector<128x128xf32> -> vector<128x128xf32>
    %c0_20 = arith.constant 0 : index
    %c0_21 = arith.constant 0 : index
    %19 = vector.load %arg8[%c0_20, %c0_21] : memref<1x128xf32, #tpu.memory_space<vmem>>, vector<1x128xf32>
    %20 = vector.broadcast %19 : vector<1x128xf32> to vector<128x128xf32>
    %21 = arith.addf %18, %20 : vector<128x128xf32>
    %22 = arith.addf %16, %21 : vector<128x128xf32>
    %c0_22 = arith.constant 0 : index
    %c0_23 = arith.constant 0 : index
    %c0_24 = arith.constant 0 : index
    %23 = vector.load %arg6[%c0_22, %c0_23, %c0_24] : memref<1x128x128xf32, #tpu.memory_space<vmem>>, vector<1x128x128xf32>
    %24 = vector.shape_cast %23 : vector<1x128x128xf32> to vector<128x128xf32>
    %c0_25 = arith.constant 0 : index
    %c0_26 = arith.constant 0 : index
    %25 = vector.load %arg10[%c0_25, %c0_26] : memref<128x128xf32, #tpu.memory_space<vmem>>, vector<128x128xf32>
    %cst_27 = arith.constant dense<0.000000e+00> : vector<128x128xf32>
    %26 = tpu.matmul %24, %25, %cst_27 {dimension_numbers = #tpu.dot_dimension_numbers<[1], [0], [0], [1], [0, 0, 1, 1], [], []>} : vector<128x128xf32>, vector<128x128xf32>, vector<128x128xf32> -> vector<128x128xf32>
    %c0_28 = arith.constant 0 : index
    %c0_29 = arith.constant 0 : index
    %27 = vector.load %arg11[%c0_28, %c0_29] : memref<1x128xf32, #tpu.memory_space<vmem>>, vector<1x128xf32>
    %28 = vector.broadcast %27 : vector<1x128xf32> to vector<128x128xf32>
    %29 = arith.addf %26, %28 : vector<128x128xf32>
    %30 = arith.truncf %22 : vector<128x128xf32> to vector<128x128xbf16>
    %cst_30 = arith.constant dense<0.000000e+00> : vector<128x128xf32>
    %31 = tpu.matmul %3, %30, %cst_30 {dimension_numbers = #tpu.dot_dimension_numbers<[1], [0], [0], [1], [0, 0, 1, 1], [], []>} : vector<128x128xbf16>, vector<128x128xbf16>, vector<128x128xf32> -> vector<128x128xf32>
    %32 = arith.extf %30 : vector<128x128xbf16> to vector<128x128xf32>
    %33 = arith.subf %31, %32 : vector<128x128xf32>
    %c0_31 = arith.constant 0 : index
    %c0_32 = arith.constant 0 : index
    %c0_33 = arith.constant 0 : index
    %34 = vector.load %arg3[%c0_31, %c0_32, %c0_33] : memref<1x128x128xbf16, #tpu.memory_space<vmem>>, vector<1x128x128xbf16>
    %35 = vector.shape_cast %34 : vector<1x128x128xbf16> to vector<128x128xbf16>
    %36 = arith.truncf %29 : vector<128x128xf32> to vector<128x128xbf16>
    %cst_34 = arith.constant dense<0.000000e+00> : vector<128x128xf32>
    %37 = tpu.matmul %35, %36, %cst_34 {dimension_numbers = #tpu.dot_dimension_numbers<[1], [0], [0], [1], [0, 0, 1, 1], [], []>} : vector<128x128xbf16>, vector<128x128xbf16>, vector<128x128xf32> -> vector<128x128xf32>
    %38 = arith.addf %33, %37 : vector<128x128xf32>
    %c0_35 = arith.constant 0 : index
    %c0_36 = arith.constant 0 : index
    %39 = vector.load %arg12[%c0_35, %c0_36] : memref<128x128xf32, #tpu.memory_space<vmem>>, vector<128x128xf32>
    %cst_37 = arith.constant dense<0.000000e+00> : vector<128x128xf32>
    %40 = tpu.matmul %38, %39, %cst_37 {dimension_numbers = #tpu.dot_dimension_numbers<[1], [0], [0], [1], [0, 0, 1, 1], [], []>} : vector<128x128xf32>, vector<128x128xf32>, vector<128x128xf32> -> vector<128x128xf32>
    %c0_38 = arith.constant 0 : index
    %c0_39 = arith.constant 0 : index
    %41 = vector.load %arg13[%c0_38, %c0_39] : memref<1x128xf32, #tpu.memory_space<vmem>>, vector<1x128xf32>
    %42 = vector.broadcast %41 : vector<1x128xf32> to vector<128x128xf32>
    %43 = arith.addf %40, %42 : vector<128x128xf32>
    %cst_40 = arith.constant 0.000000e+00 : f32
    %44 = vector.broadcast %cst_40 : f32 to vector<128x128xf32>
    %45 = arith.maximumf %43, %44 : vector<128x128xf32>
    %c0_41 = arith.constant 0 : index
    %c0_42 = arith.constant 0 : index
    %46 = vector.load %arg14[%c0_41, %c0_42] : memref<128x128xf32, #tpu.memory_space<vmem>>, vector<128x128xf32>
    %cst_43 = arith.constant dense<0.000000e+00> : vector<128x128xf32>
    %47 = tpu.matmul %45, %46, %cst_43 {dimension_numbers = #tpu.dot_dimension_numbers<[1], [0], [0], [1], [0, 0, 1, 1], [], []>} : vector<128x128xf32>, vector<128x128xf32>, vector<128x128xf32> -> vector<128x128xf32>
    %c0_44 = arith.constant 0 : index
    %c0_45 = arith.constant 0 : index
    %48 = vector.load %arg15[%c0_44, %c0_45] : memref<1x128xf32, #tpu.memory_space<vmem>>, vector<1x128xf32>
    %49 = vector.broadcast %48 : vector<1x128xf32> to vector<128x128xf32>
    %50 = arith.addf %47, %49 : vector<128x128xf32>
    %51 = arith.addf %50, %22 : vector<128x128xf32>
    %cst_46 = arith.constant dense<0.000000e+00> : vector<8x128xf32>
    %52 = tpu.matmul %5, %51, %cst_46 {dimension_numbers = #tpu.dot_dimension_numbers<[1], [0], [0], [1], [0, 0, 1, 1], [], []>} : vector<8x128xf32>, vector<128x128xf32>, vector<8x128xf32> -> vector<8x128xf32>
    %c0_47 = arith.constant 0 : index
    %c0_48 = arith.constant 0 : index
    %53 = vector.load %arg16[%c0_47, %c0_48] : memref<128x128xf32, #tpu.memory_space<vmem>>, vector<128x128xf32>
    %cst_49 = arith.constant dense<0.000000e+00> : vector<8x128xf32>
    %54 = tpu.matmul %52, %53, %cst_49 {dimension_numbers = #tpu.dot_dimension_numbers<[1], [0], [0], [1], [0, 0, 1, 1], [], []>} : vector<8x128xf32>, vector<128x128xf32>, vector<8x128xf32> -> vector<8x128xf32>
    %c0_50 = arith.constant 0 : index
    %c0_51 = arith.constant 0 : index
    %55 = vector.load %arg17[%c0_50, %c0_51] : memref<1x128xf32, #tpu.memory_space<vmem>>, vector<1x128xf32>
    %56 = vector.broadcast %55 : vector<1x128xf32> to vector<8x128xf32>
    %57 = arith.addf %54, %56 : vector<8x128xf32>
    %c0_52 = arith.constant 0 : index
    %c0_53 = arith.constant 0 : index
    %c0_54 = arith.constant 0 : index
    %58 = vector.load %arg18[%c0_52, %c0_53, %c0_54] : memref<1x8x128xf32, #tpu.memory_space<vmem>>, vector<1x8x128xf32>
    %59 = vector.shape_cast %58 : vector<1x8x128xf32> to vector<8x128xf32>
    %60 = vector.shape_cast %57 : vector<8x128xf32> to vector<1x8x128xf32>
    tpu.vector_store %arg18[%c0_52, %c0_53, %c0_54], %60 {strides = array<i32>} : memref<1x8x128xf32, #tpu.memory_space<vmem>>, vector<1x8x128xf32>,
    return
  }
  func.func @transform_0(%arg0: i32) -> (i32, i32, i32) {
    %c0_i32 = arith.constant 0 : i32
    %c0_i32_0 = arith.constant 0 : i32
    %c0_i32_1 = arith.constant 0 : i32
    return %arg0, %c0_i32, %c0_i32_0 : i32, i32, i32
  }
  func.func @transform_1(%arg0: i32) -> (i32, i32, i32) {
    %c0_i32 = arith.constant 0 : i32
    %c0_i32_0 = arith.constant 0 : i32
    %c0_i32_1 = arith.constant 0 : i32
    return %arg0, %c0_i32, %c0_i32_0 : i32, i32, i32
  }
  func.func @transform_2(%arg0: i32) -> (i32, i32, i32) {
    %c0_i32 = arith.constant 0 : i32
    %c0_i32_0 = arith.constant 0 : i32
    %c0_i32_1 = arith.constant 0 : i32
    return %arg0, %c0_i32, %c0_i32_0 : i32, i32, i32
  }
  func.func @transform_3(%arg0: i32) -> (i32, i32, i32) {
    %c0_i32 = arith.constant 0 : i32
    %c0_i32_0 = arith.constant 0 : i32
    %c0_i32_1 = arith.constant 0 : i32
    return %arg0, %c0_i32, %c0_i32_0 : i32, i32, i32
  }
  func.func @transform_4(%arg0: i32) -> (i32, i32, i32) {
    %c0_i32 = arith.constant 0 : i32
    %c0_i32_0 = arith.constant 0 : i32
    %c0_i32_1 = arith.constant 0 : i32
    return %arg0, %c0_i32, %c0_i32_0 : i32, i32, i32
  }
  func.func @transform_5(%arg0: i32) -> (i32, i32, i32) {
    %c0_i32 = arith.constant 0 : i32
    %c0_i32_0 = arith.constant 0 : i32
    %c0_i32_1 = arith.constant 0 : i32
    return %arg0, %c0_i32, %c0_i32_0 : i32, i32, i32
  }
  func.func @transform_6(%arg0: i32) -> (i32, i32) {
    %c0_i32 = arith.constant 0 : i32
    %c0_i32_0 = arith.constant 0 : i32
    %c0_i32_1 = arith.constant 0 : i32
    return %c0_i32, %c0_i32_0 : i32, i32
  }
  func.func @transform_7(%arg0: i32) -> (i32, i32) {
    %c0_i32 = arith.constant 0 : i32
    %c0_i32_0 = arith.constant 0 : i32
    %c0_i32_1 = arith.constant 0 : i32
    return %c0_i32, %c0_i32_0 : i32, i32
  }
  func.func @transform_8(%arg0: i32) -> (i32, i32) {
    %c0_i32 = arith.constant 0 : i32
    %c0_i32_0 = arith.constant 0 : i32
    %c0_i32_1 = arith.constant 0 : i32
    return %c0_i32, %c0_i32_0 : i32, i32
  }
  func.func @transform_9(%arg0: i32) -> (i32, i32) {
    %c0_i32 = arith.constant 0 : i32
    %c0_i32_0 = arith.constant 0 : i32
    %c0_i32_1 = arith.constant 0 : i32
    return %c0_i32, %c0_i32_0 : i32, i32
  }
  func.func @transform_10(%arg0: i32) -> (i32, i32) {
    %c0_i32 = arith.constant 0 : i32
    %c0_i32_0 = arith.constant 0 : i32
    %c0_i32_1 = arith.constant 0 : i32
    return %c0_i32, %c0_i32_0 : i32, i32
  }
  func.func @transform_11(%arg0: i32) -> (i32, i32) {
    %c0_i32 = arith.constant 0 : i32
    %c0_i32_0 = arith.constant 0 : i32
    %c0_i32_1 = arith.constant 0 : i32
    return %c0_i32, %c0_i32_0 : i32, i32
  }
  func.func @transform_12(%arg0: i32) -> (i32, i32) {
    %c0_i32 = arith.constant 0 : i32
    %c0_i32_0 = arith.constant 0 : i32
    %c0_i32_1 = arith.constant 0 : i32
    return %c0_i32, %c0_i32_0 : i32, i32
  }
  func.func @transform_13(%arg0: i32) -> (i32, i32) {
    %c0_i32 = arith.constant 0 : i32
    %c0_i32_0 = arith.constant 0 : i32
    %c0_i32_1 = arith.constant 0 : i32
    return %c0_i32, %c0_i32_0 : i32, i32
  }
  func.func @transform_14(%arg0: i32) -> (i32, i32) {
    %c0_i32 = arith.constant 0 : i32
    %c0_i32_0 = arith.constant 0 : i32
    %c0_i32_1 = arith.constant 0 : i32
    return %c0_i32, %c0_i32_0 : i32, i32
  }
  func.func @transform_15(%arg0: i32) -> (i32, i32) {
    %c0_i32 = arith.constant 0 : i32
    %c0_i32_0 = arith.constant 0 : i32
    %c0_i32_1 = arith.constant 0 : i32
    return %c0_i32, %c0_i32_0 : i32, i32
  }
  func.func @transform_16(%arg0: i32) -> (i32, i32) {
    %c0_i32 = arith.constant 0 : i32
    %c0_i32_0 = arith.constant 0 : i32
    %c0_i32_1 = arith.constant 0 : i32
    return %c0_i32, %c0_i32_0 : i32, i32
  }
  func.func @transform_17(%arg0: i32) -> (i32, i32, i32) {
    %c0_i32 = arith.constant 0 : i32
    %c0_i32_0 = arith.constant 0 : i32
    %c0_i32_1 = arith.constant 0 : i32
    return %arg0, %c0_i32, %c0_i32_0 : i32, i32, i32
  }
}

</mosaic_0001>

<bundles_post_ra>
// kernel: tpu_custom_call.1
= control target key start
LH: loop header
LB: loop body
LE: loop exit
PB: predicated region body
PF: predicated region fallthrough
CT: control target
= control target key end

     0   :  { %s5500_s0 = inlined_call_operand.vmem [shape: f32[2,128,128], index: 0, kind: input, shape index: {}]   ;;  %s5501_s1 = inlined_call_operand.hbm [shape: bf16[2,128,128], index: 1, kind: input, shape index: {}]   ;;  %s5502_s2 = inlined_call_operand.hbm [shape: bf16[2,128,128], index: 2, kind: input, shape index: {}]   ;;  %s5503_s3 = inlined_call_operand.vmem [shape: f32[2,8,128], index: 3, kind: input, shape index: {}]   ;;  %s5504_s4 = inlined_call_operand.vmem [shape: f32[2,128,8], index: 4, kind: input, shape index: {}]   ;;  %s5505_s5 = inlined_call_operand.hbm [shape: f32[2,128,128], index: 5, kind: input, shape index: {}]   ;;  %s5506_s6 = inlined_call_operand.hbm [shape: f32[128,128], index: 6, kind: input, shape index: {}]   ;;  %s5507_s7 = inlined_call_operand.vmem [shape: f32[1,128], index: 7, kind: input, shape index: {}]   ;;  %s5508_s8 = inlined_call_operand.hbm [shape: f32[128,128], index: 8, kind: input, shape index: {}]   ;;  %s5509_s9 = inlined_call_operand.hbm [shape: f32[128,128], index: 9, kind: input, shape index: {}]   ;;  %s5510_s10 = inlined_call_operand.vmem [shape: f32[1,128], index: 10, kind: input, shape index: {}]   ;;  %s5511_s11 = inlined_call_operand.hbm [shape: f32[128,128], index: 11, kind: input, shape index: {}]   ;;  %s5512_s12 = inlined_call_operand.vmem [shape: f32[1,128], index: 12, kind: input, shape index: {}]   ;;  %s5513_s13 = inlined_call_operand.hbm [shape: f32[128,128], index: 13, kind: input, shape index: {}]   ;;  %s5514_s14 = inlined_call_operand.vmem [shape: f32[1,128], index: 14, kind: input, shape index: {}]   ;;  %s5515_s15 = inlined_call_operand.hbm [shape: f32[128,128], index: 15, kind: input, shape index: {}]   ;;  %s5516_s16 = inlined_call_operand.vmem [shape: f32[1,128], index: 16, kind: input, shape index: {}]   ;;  %s5517_s17 = inlined_call_operand.hbm [shape: f32[2,8,128], index: 17, kind: output, shape index: {}]  }
   0x1   :  { %5546 = sst [smem:[#allocation30_spill]] %s5500_s0 }
   0x2   :  { %5547 = sst [smem:[#allocation31_spill]] %s5501_s1 }
   0x3   :  { %5548 = sst [smem:[#allocation32_spill]] %s5502_s2 }
   0x4   :  { %5549 = sst [smem:[#allocation33_spill]] %s5504_s4 }
   0x5   :  { %5550 = sst [smem:[#allocation34_spill]] %s5506_s6 }
   0x6   :  { %5551 = sst [smem:[#allocation35_spill]] %s5507_s7 }
   0x7   :  { %5552 = sst [smem:[#allocation36_spill]] %s5509_s9 }
   0x8   :  { %5553 = sst [smem:[#allocation37_spill]] %s5510_s10 }
   0x9   :  { %5554 = sst [smem:[#allocation38_spill]] %s5512_s12 }
   0xa   :  { %5555 = sst [smem:[#allocation39_spill]] %s5513_s13 }
   0xb   :  { %5556 = sst [smem:[#allocation40_spill]] %s5514_s14 }
   0xc   :  { %5557 = sst [smem:[#allocation41_spill]] %s5516_s16 }
   0xd   :  { %5558 = sst [smem:[#allocation42_spill]] %s5517_s17 }
   0xe   :  { %22 = vsyncpa [#allocation3], 0 }
   0xf   :  { %24 = vsyncpa [#allocation3 + $0x1], 0 }
  0x10   :  { %25 = vsyncpa [#allocation6], 0 }
  0x11   :  { %27 = vsyncpa [#allocation6 + $0x1], 0 }
  0x12   :  { %28 = vsyncpa [#allocation9], 0 }
  0x13   :  { %29 = vsyncpa [#allocation12], 0 }
  0x14   :  { %30 = vsyncpa [#allocation15], 0 }
  0x15   :  { %31 = vsyncpa [#allocation4], 0 }
  0x16   :  { %33 = vsyncpa [#allocation4 + $0x1], 0  ;;  %s4575_s24 = smov 0   ;;  %s4577_s25 = smov 0  }
  0x17   :  { %s4579_s26 = smov 0   ;;  %s4581_s27 = smov 0  }
  0x18 LB: > { %5559 = sst [smem:[#allocation24_spill]] %s4454_s24  ;;  %s4468_s28 = smov [#allocation8]   ;;  %s4466_s27 = sphi %s4581_s27, %s5609_s27   ;;  %s4462_s26 = sphi %s4579_s26, %s5611_s26   ;;  %s4458_s25 = sphi %s4577_s25, %s5613_s25   ;;  %s4454_s24 = sphi %s4575_s24, %s5612_s24  }
  0x19   : > { %5560 = sst [smem:[#allocation25_spill]] %s4462_s26  ;;  %s469_s29 = sshll.u32 %s4468_s28, 4  ;;  %s4601_s29 = int_to_ptr.vmem [resolvable:$true] %s469_s29 }
  0x1a   : > { %s4596_s0 = sadd.s32 4294967295, %s4466_s27   ;;  %p2891_p0 = scmp.ge.s32.totalorder %s4466_s27, 1 }
  0x1b   : > { %p5527_p1 = scmp.eq.s32.totalorder %s4596_s0, 0  ;;  %p457_p2 = scmp.lt.s32.totalorder %s4466_s27, 3 }
  0x1c   : > { %s4469_s18 = smov [#allocation11]   ;;  %s4470_s20 = smov [#allocation14]  }
  0x1d   : > { %p4603_p3 = pnand %p2891_p0, %p457_p2  ;;  %s498_s19 = sshll.u32 %s4469_s18, 4  ;;  %s4616_s19 = int_to_ptr.vmem [resolvable:$true] %s498_s19 }
  0x1e   : > { %s530_s21 = sshll.u32 %s4470_s20, 4  ;;  %s5563_s6 = sld [smem:[#allocation34_spill]]  ;;  %s4618_s21 = int_to_ptr.vmem [resolvable:$true] %s530_s21 }
  0x1f   : > { %s5561_s30 = scalar_select %p4603_p3, 1, 0 }
  0x20   : > { %p4017_p5 = pneg %p4603_p3 }
  0x22   : > { %p4612_p6 = pnand %p4017_p5, %p5527_p1 }
  0x24   : > { %s5562_s1 = scalar_select %p4612_p6, 1, 0 }
  0x25   : > { %s4126_s28 = scalar_lea.hbm %s5563_s6, 2048  ;;  %p4628_p8 = pneg %p4612_p6 }
  0x26   : > { %p4127_p7 = scmp.ne.s32.totalorder %s5563_s6, %s4126_s28  ;;  %p4133_p11 = scmp.lt.u32.totalorder %s4126_s28, %s5563_s6 }
  0x27   : > { %s5564_s18 = scalar_select %p4628_p8, 1, 0 }
  0x28   : > { %p4129_p9 = pnand %p4628_p8, %p4127_p7 }
  0x2a   : > { %p4130_p10 = pneg %p4129_p9 }
  0x2c   : > { %p4135_p12 = pnand %p4133_p11, %p4130_p10 }
  0x2e   : > { %4138 = shalt.err (!%p4135_p12)
}
  0x2f   : > { %s4139_s16 = scalar_lea.vmem %s4601_s29, 2048  ;;  %p4147_p5 = scmp.lt.s32.totalorder %s4601_s29, %s4601_s29 }
  0x30   : > { %p4140_p13 = scmp.ne.s32.totalorder %s4601_s29, %s4139_s16  ;;  %p4148_p4 = scmp.lt.s32.totalorder %s4139_s16, %s4139_s16 }
  0x32   : > { %p4142_p0 = pnand %p4140_p13, %p4628_p8  ;;  %p4149_p7 = por %p4148_p4, %p4147_p5 }
  0x34   : > { %p4143_p2 = pneg %p4142_p0 }
  0x36   : > { %p4150_p9 = pnand %p4149_p7, %p4143_p2 }
  0x38   : > { %4153 = shalt.err (!%p4150_p9)
}
  0x39   : > { %s5521_s17 = smov 128   ;;  %s5523_s14 = smov 8  }
  0x3a   : > { %4020 = dma.hbm_to_vmem [thread:$0]  (!%p4612_p6), %s5563_s6, 2048, %s4601_s29, [#allocation9], %s5521_s17, %s5521_s17, %s5523_s14  }
  0x3b   : > { %s5565_s9 = sld [smem:[#allocation36_spill]] }
  0x41   : > { %s4154_s16 = scalar_lea.hbm %s5565_s9, 2048 }
  0x42   : > { %p4155_p4 = scmp.ne.s32.totalorder %s5565_s9, %s4154_s16  ;;  %p4161_p12 = scmp.lt.u32.totalorder %s4154_s16, %s5565_s9 }
  0x44   : > { %p4157_p10 = pnand %p4155_p4, %p4628_p8 }
  0x46   : > { %p4158_p11 = pneg %p4157_p10 }
  0x48   : > { %p4163_p13 = pnand %p4161_p12, %p4158_p11 }
  0x4a   : > { %4166 = shalt.err (!%p4163_p13)
}
  0x4b   : > { %s4167_s29 = scalar_lea.vmem %s4616_s19, 2048  ;;  %p4175_p7 = scmp.lt.s32.totalorder %s4616_s19, %s4616_s19 }
  0x4c   : > { %p4168_p0 = scmp.ne.s32.totalorder %s4616_s19, %s4167_s29  ;;  %p4176_p9 = scmp.lt.s32.totalorder %s4167_s29, %s4167_s29 }
  0x4e   : > { %p4170_p2 = pnand %p4168_p0, %p4628_p8  ;;  %p4177_p4 = por %p4176_p9, %p4175_p7 }
  0x50   : > { %p4171_p5 = pneg %p4170_p2 }
  0x52   : > { %p4178_p10 = pnand %p4177_p4, %p4171_p5 }
  0x54   : > { %4181 = shalt.err (!%p4178_p10)
}
  0x55   : > { %4026 = dma.hbm_to_vmem [thread:$0]  (!%p4612_p6), %s5565_s9, 2048, %s4616_s19, [#allocation12], %s5521_s17, %s5521_s17, %s5523_s14  }
  0x56   : > { %s5566_s13 = sld [smem:[#allocation39_spill]] }
  0x5c   : > { %s4182_s22 = scalar_lea.hbm %s5566_s13, 2048 }
  0x5d   : > { %p4183_p11 = scmp.ne.s32.totalorder %s5566_s13, %s4182_s22  ;;  %p4189_p0 = scmp.lt.u32.totalorder %s4182_s22, %s5566_s13 }
  0x5f   : > { %p4185_p12 = pnand %p4183_p11, %p4628_p8 }
  0x61   : > { %p4186_p13 = pneg %p4185_p12 }
  0x63   : > { %p4191_p2 = pnand %p4189_p0, %p4186_p13 }
  0x65   : > { %4194 = shalt.err (!%p4191_p2)
}
  0x66   : > { %s4195_s19 = scalar_lea.vmem %s4618_s21, 2048  ;;  %p4203_p4 = scmp.lt.s32.totalorder %s4618_s21, %s4618_s21 }
  0x67   : > { %p4196_p5 = scmp.ne.s32.totalorder %s4618_s21, %s4195_s19  ;;  %p4204_p10 = scmp.lt.s32.totalorder %s4195_s19, %s4195_s19 }
  0x69   : > { %p4198_p7 = pnand %p4196_p5, %p4628_p8  ;;  %p4205_p11 = por %p4204_p10, %p4203_p4 }
  0x6b   : > { %p4199_p9 = pneg %p4198_p7 }
  0x6d   : > { %p4206_p12 = pnand %p4205_p11, %p4199_p9 }
  0x6f   : > { %4209 = shalt.err (!%p4206_p12)
}
  0x70   : > { %4032 = dma.hbm_to_vmem [thread:$0]  (!%p4612_p6), %s5566_s13, 2048, %s4618_s21, [#allocation15], %s5521_s17, %s5521_s17, %s5523_s14  }
  0x71   : > { %s2890_s7 = sadd.s32 4294967294, %s4466_s27   ;;  %s4706_s10 = sadd.s32 1, %s4466_s27  }
  0x72   : > { %5567 = sst [smem:[#allocation26_spill]] %s4706_s10  ;;  %s72_s12 = sadd.s32 1, %s4462_s26 }
  0x73   : > { %s69_s22 = ssub.s32 %s4466_s27, %s4706_s10  ;;  %p79_p13 = scmp.ne.s32.totalorder %s4462_s26, %s4458_s25 }
  0x74   : > { %p70_p0 = scmp.eq.s32.totalorder %s69_s22, 0  ;;  %p80_p2 = scmp.eq.s32.totalorder %s4466_s27, 0 }
  0x75   : > { %p85_p5 = scmp.ne.s32.totalorder %s4458_s25, %s4454_s24  ;;  %p444_p7 = scmp.eq.s32.totalorder %s4596_s0, 1 }
  0x76   : > { %s4718_s23 = scalar_select %p70_p0, %s4462_s26, %s72_s12  }
  0x77   : > { %p81_p9 = por %p80_p2, %p79_p13  ;;  %p4722_p4 = por %p5527_p1, %p85_p5 }
  0x78   : > { %5568 = sst [smem:[#allocation27_spill]] %s4718_s23  ;;  %p4726_p10 = por %p444_p7, %p79_p13 }
  0x79   : > { %s5569_s21 = scalar_select %p4722_p4, 1, 0 }
  0x7a   : > { %s5570_s28 = scalar_select %p4726_p10, 1, 0 }
  0x7b   : > { %p450_p11 = scmp.eq.s32.totalorder %s2890_s7, 1  ;;  %p4056_p12 = scmp.lt.s32.totalorder %s4466_s27, 2 }
  0x7c   : > { %5571 = sst [smem:[#allocation28_spill]] %s5570_s28  ;;  %s4732_s20 = sand.u32 1, %s4462_s26  }
  0x7d   : > { %p4734_p3 = por %p450_p11, %p85_p5  ;;  %s5525_s19 = sshll.u32 %s4732_s20, 6 }
  0x7e   : > { %s5526_s29 = sshll.u32 %s4466_s27, 10  ;;  %p4740_p0 = pnand %p4056_p12, %p81_p9 }
  0x7f   : > { %s5572_s16 = scalar_select %p4734_p3, 1, 0 }
  0x80   : > { %s5574_s4 = scalar_select %p4740_p0, 1, 0 }
  0x81   : > { %5573 = sst [smem:[#allocation29_spill]] %s5572_s16  ;;  %s592_s12 = sand.u32 1, %s4466_s27  }
  0x82   : > { %s5575_s2 = sld [smem:[#allocation32_spill]]  ;;  %s596_s14 = scalar_lea.vmem [#allocation5], %s5525_s19 }
  0x83   : > { %s603_s6 = sshll.u32 %s596_s14, 4  ;;  %s4756_s9 = scalar_lea.sflag [#allocation6], %s592_s12  ;;  %s4754_s6 = int_to_ptr.vmem [resolvable:$true] %s603_s6 }
  0x84   : > { %p4762_p2 = pneg %p4740_p0 }
  0x86   : > { %s5576_s23 = scalar_select %p4762_p2, 1, 0 }
  0x88   : > { %s4750_s17 = scalar_lea.hbm %s5575_s2, %s5526_s29  ;;  %s4215_s19 = scalar_lea.hbm %s5575_s2, 2048 }
  0x89   : > { %s4210_s13 = scalar_lea.hbm %s4750_s17, 1024  ;;  %p4216_p9 = scmp.lt.u32.totalorder %s4750_s17, %s5575_s2 }
  0x8a   : > { %p4211_p13 = scmp.ne.s32.totalorder %s4750_s17, %s4210_s13  ;;  %p4217_p11 = scmp.lt.u32.totalorder %s4215_s19, %s4210_s13 }
  0x8b   : > { %p4219_p1 = scmp.lt.u32.totalorder %s4210_s13, %s4750_s17 }
  0x8c   : > { %p4213_p5 = pnand %p4762_p2, %p4211_p13  ;;  %p4218_p12 = por %p4217_p11, %p4216_p9 }
  0x8e   : > { %p4214_p7 = pneg %p4213_p5  ;;  %p4220_p3 = por %p4219_p1, %p4218_p12 }
  0x90   : > { %p4221_p10 = pnand %p4220_p3, %p4214_p7 }
  0x92   : > { %4224 = shalt.err (!%p4221_p10)
}
  0x93   : > { %s4225_s12 = scalar_lea.vmem %s4754_s6, 1024  ;;  %s4473_s22 = smov [#allocation5]  }
  0x94   : > { %p4226_p13 = scmp.ne.s32.totalorder %s4754_s6, %s4225_s12  ;;  %s4230_s7 = sshll.u32 %s4473_s22, 4  ;;  %s4231_s7 = int_to_ptr.vmem [resolvable:$false] %s4230_s7 }
  0x95   : > { %s4232_s29 = scalar_lea.vmem %s4231_s7, 2048  ;;  %p4233_p6 = scmp.lt.s32.totalorder %s4754_s6, %s4231_s7 }
  0x96   : > { %p4228_p5 = pnand %p4226_p13, %p4762_p2  ;;  %p4234_p8 = scmp.lt.s32.totalorder %s4232_s29, %s4225_s12 }
  0x98   : > { %p4229_p4 = pneg %p4228_p5  ;;  %p4235_p9 = por %p4234_p8, %p4233_p6 }
  0x9a   : > { %p4236_p11 = pnand %p4235_p9, %p4229_p4 }
  0x9c   : > { %4239 = shalt.err (!%p4236_p11)
}
  0x9d   : > { %s5545_s13 = smov 64   ;;  %s4475_s19 = smov 4  }
  0x9e   : > { %4042 = dma.hbm_to_vmem [thread:$0]  (!%p4740_p0), %s4750_s17, 1024, %s4754_s6, %s4756_s9, %s5545_s13, %s5545_s13, %s4475_s19  }
  0x9f   : > { %s4476_s14 = smov [#allocation10]   ;;  %s4477_s7 = smov [#allocation13]  }
  0xa0   : > { %s485_s22 = sshll.u32 %s4476_s14, 4  ;;  %s514_s12 = sshll.u32 %s4477_s7, 4  ;;  %s486_s22 = int_to_ptr.vmem [resolvable:$true] %s485_s22  ;;  %s515_s12 = int_to_ptr.vmem [resolvable:$true] %s514_s12 }
  0xa1   : > { %s4240_s26 = scalar_lea.hbm %s5508_s8, 2048  ;;  %p5577_p3 = scmp.ne.s32.totalorder %s5564_s18, 0 }
  0xa2   : > { %p4241_p1 = scmp.ne.s32.totalorder %s5508_s8, %s4240_s26  ;;  %p4247_p4 = scmp.lt.u32.totalorder %s4240_s26, %s5508_s8 }
  0xa4   : > { %p4243_p6 = pnand %p4241_p1, %p5577_p3 }
  0xa6   : > { %p4244_p8 = pneg %p4243_p6 }
  0xa8   : > { %p4249_p10 = pnand %p4247_p4, %p4244_p8 }
  0xaa   : > { %4252 = shalt.err (!%p4249_p10)
}
  0xab   : > { %s4253_s6 = scalar_lea.vmem %s486_s22, 2048  ;;  %p4261_p5 = scmp.lt.s32.totalorder %s486_s22, %s486_s22 }
  0xac   : > { %p4254_p7 = scmp.ne.s32.totalorder %s486_s22, %s4253_s6  ;;  %p4262_p9 = scmp.lt.s32.totalorder %s4253_s6, %s4253_s6 }
  0xae   : > { %p4256_p12 = pnand %p4254_p7, %p5577_p3  ;;  %p4263_p11 = por %p4262_p9, %p4261_p5 }
  0xb0   : > { %p4257_p13 = pneg %p4256_p12 }
  0xb2   : > { %p4264_p0 = pnand %p4263_p11, %p4257_p13 }
  0xb4   : > { %4267 = shalt.err (!%p4264_p0)
}
  0xb5   : > { %p5578_p1 = scmp.ne.s32.totalorder %s5562_s1, 0  ;;  %s5579_s2 = smov 8  }
  0xb6   : > { %s5580_s17 = smov 128   ;;  %s4268_s16 = scalar_lea.hbm %s5511_s11, 2048 }
  0xb7   : > { %4023 = dma.hbm_to_vmem [thread:$0]  (!%p5578_p1), %s5508_s8, 2048, %s486_s22, [#allocation9], %s5580_s17, %s5580_s17, %s5579_s2  }
  0xb8   : > { %p4269_p6 = scmp.ne.s32.totalorder %s5511_s11, %s4268_s16  ;;  %p4275_p4 = scmp.lt.u32.totalorder %s4268_s16, %s5511_s11 }
  0xba   : > { %p4271_p0 = pnand %p4269_p6, %p5577_p3 }
  0xbc   : > { %p4272_p8 = pneg %p4271_p0 }
  0xbe   : > { %p4277_p10 = pnand %p4275_p4, %p4272_p8 }
  0xc0   : > { %4280 = shalt.err (!%p4277_p10)
}
  0xc1   : > { %s4281_s24 = scalar_lea.vmem %s515_s12, 2048  ;;  %p4289_p5 = scmp.lt.s32.totalorder %s515_s12, %s515_s12 }
  0xc2   : > { %p4282_p7 = scmp.ne.s32.totalorder %s515_s12, %s4281_s24  ;;  %p4290_p9 = scmp.lt.s32.totalorder %s4281_s24, %s4281_s24 }
  0xc4   : > { %p4284_p12 = pnand %p4282_p7, %p5577_p3  ;;  %p4291_p11 = por %p4290_p9, %p4289_p5 }
  0xc6   : > { %p4285_p13 = pneg %p4284_p12 }
  0xc8   : > { %p4292_p2 = pnand %p4291_p11, %p4285_p13 }
  0xca   : > { %4295 = shalt.err (!%p4292_p2)
}
  0xcb   : > { %4029 = dma.hbm_to_vmem [thread:$0]  (!%p5578_p1), %s5511_s11, 2048, %s515_s12, [#allocation12], %s5580_s17, %s5580_s17, %s5579_s2  }
  0xcc   : > { %s4478_s10 = smov [#allocation16]   ;;  %s4296_s7 = scalar_lea.hbm %s5515_s15, 2048 }
  0xcd   : > { %s546_s28 = sshll.u32 %s4478_s10, 4  ;;  %p4297_p2 = scmp.ne.s32.totalorder %s5515_s15, %s4296_s7  ;;  %s547_s28 = int_to_ptr.vmem [resolvable:$true] %s546_s28 }
  0xce   : > { %p4303_p8 = scmp.lt.u32.totalorder %s4296_s7, %s5515_s15 }
  0xcf   : > { %p4299_p6 = pnand %p4297_p2, %p5577_p3 }
  0xd1   : > { %p4300_p0 = pneg %p4299_p6 }
  0xd3   : > { %p4305_p4 = pnand %p4303_p8, %p4300_p0 }
  0xd5   : > { %4308 = shalt.err (!%p4305_p4)
}
  0xd6   : > { %s4309_s12 = scalar_lea.vmem %s547_s28, 2048  ;;  %p4317_p13 = scmp.lt.s32.totalorder %s547_s28, %s547_s28 }
  0xd7   : > { %p4310_p10 = scmp.ne.s32.totalorder %s547_s28, %s4309_s12  ;;  %p4318_p5 = scmp.lt.s32.totalorder %s4309_s12, %s4309_s12 }
  0xd9   : > { %p4312_p7 = pnand %p4310_p10, %p5577_p3  ;;  %p4319_p9 = por %p4318_p5, %p4317_p13 }
  0xdb   : > { %p4313_p12 = pneg %p4312_p7 }
  0xdd   : > { %p4320_p11 = pnand %p4319_p9, %p4313_p12 }
  0xdf   : > { %4323 = shalt.err (!%p4320_p11)
}
  0xe0   : > { %4035 = dma.hbm_to_vmem [thread:$0]  (!%p5578_p1), %s5515_s15, 2048, %s547_s28, [#allocation15], %s5580_s17, %s5580_s17, %s5579_s2  }
  0xe1   : > { %s5581_s18 = sshll.u32 %s4466_s27, 10  ;;  %s5582_s16 = sld [smem:[#allocation31_spill]] }
  0xe2   : > { %s5583_s7 = sshll.u32 %s4732_s20, 6  ;;  %s2905_s6 = sshll.u32 %s4732_s20, 7 }
  0xe3   : > { %s575_s1 = scalar_lea.vmem [#allocation2], %s5583_s7  ;;  %s572_s24 = scalar_lea.sflag [#allocation3], %s4732_s20 }
  0xe4   : > { %s582_s29 = sshll.u32 %s575_s1, 4  ;;  %p5584_p1 = scmp.ne.s32.totalorder %s5576_s23, 0  ;;  %s4861_s29 = int_to_ptr.vmem [resolvable:$true] %s582_s29 }
  0xe7   : > { %s4857_s14 = scalar_lea.hbm %s5582_s16, %s5581_s18  ;;  %s4329_s22 = scalar_lea.hbm %s5582_s16, 2048 }
  0xe8   : > { %s4324_s12 = scalar_lea.hbm %s4857_s14, 1024  ;;  %p4330_p0 = scmp.lt.u32.totalorder %s4857_s14, %s5582_s16 }
  0xe9   : > { %p4325_p3 = scmp.ne.s32.totalorder %s4857_s14, %s4324_s12  ;;  %p4331_p8 = scmp.lt.u32.totalorder %s4329_s22, %s4324_s12 }
  0xea   : > { %p4333_p10 = scmp.lt.u32.totalorder %s4324_s12, %s4857_s14 }
  0xeb   : > { %p4327_p2 = pnand %p4325_p3, %p5584_p1  ;;  %p4332_p4 = por %p4331_p8, %p4330_p0 }
  0xed   : > { %p4328_p6 = pneg %p4327_p2  ;;  %p4334_p7 = por %p4333_p10, %p4332_p4 }
  0xef   : > { %p4335_p12 = pnand %p4334_p7, %p4328_p6 }
  0xf1   : > { %4338 = shalt.err (!%p4335_p12)
}
  0xf2   : > { %s4339_s10 = scalar_lea.vmem %s4861_s29, 1024  ;;  %s4479_s7 = smov [#allocation2]  }
  0xf3   : > { %p4340_p13 = scmp.ne.s32.totalorder %s4861_s29, %s4339_s10  ;;  %s4344_s1 = sshll.u32 %s4479_s7, 4  ;;  %s4345_s1 = int_to_ptr.vmem [resolvable:$false] %s4344_s1 }
  0xf4   : > { %s4346_s28 = scalar_lea.vmem %s4345_s1, 2048  ;;  %p4347_p11 = scmp.lt.s32.totalorder %s4861_s29, %s4345_s1 }
  0xf5   : > { %p4342_p5 = pnand %p4340_p13, %p5584_p1  ;;  %p4348_p3 = scmp.lt.s32.totalorder %s4346_s28, %s4339_s10 }
  0xf7   : > { %p4343_p9 = pneg %p4342_p5  ;;  %p4349_p2 = por %p4348_p3, %p4347_p11 }
  0xf9   : > { %p4350_p0 = pnand %p4349_p2, %p4343_p9 }
  0xfb   : > { %4353 = shalt.err (!%p4350_p0)
}
  0xfc   : > { %p5585_p6 = scmp.ne.s32.totalorder %s5574_s4, 0  ;;  %s5586_s12 = smov 64  }
  0xfd   : > { %s2967_s13 = sshll.u32 %s4466_s27, 11  ;;  %s632_s10 = scalar_lea.vmem [#allocation7], %s2905_s6 }
  0xfe   : > { %4039 = dma.hbm_to_vmem [thread:$0]  (!%p5585_p6), %s4857_s14, 1024, %s4861_s29, %s572_s24, %s5586_s12, %s5586_s12, %s4475_s19  }
  0xff   : > { %s4895_s26 = scalar_lea.hbm %s5505_s5, %s2967_s13  ;;  %s639_s7 = sshll.u32 %s632_s10, 4  ;;  %s4899_s7 = int_to_ptr.vmem [resolvable:$true] %s639_s7 }
 0x100   : > { %s4354_s1 = scalar_lea.hbm %s4895_s26, 2048  ;;  %s4359_s29 = scalar_lea.hbm %s5505_s5, 4096 }
 0x101   : > { %p4355_p8 = scmp.ne.s32.totalorder %s4895_s26, %s4354_s1  ;;  %p4360_p7 = scmp.lt.u32.totalorder %s4895_s26, %s5505_s5 }
 0x102   : > { %p4361_p12 = scmp.lt.u32.totalorder %s4359_s29, %s4354_s1  ;;  %p4363_p5 = scmp.lt.u32.totalorder %s4354_s1, %s4895_s26 }
 0x103   : > { %p4357_p4 = pnand %p4355_p8, %p5584_p1 }
 0x104   : > { %p4362_p13 = por %p4361_p12, %p4360_p7 }
 0x105   : > { %p4358_p10 = pneg %p4357_p4 }
 0x106   : > { %p4364_p9 = por %p4363_p5, %p4362_p13 }
 0x108   : > { %p4365_p11 = pnand %p4364_p9, %p4358_p10 }
 0x10a   : > { %4368 = shalt.err (!%p4365_p11)
}
 0x10b   : > { %s4369_s20 = scalar_lea.vmem %s4899_s7, 2048  ;;  %s4480_s6 = smov [#allocation7]  }
 0x10c   : > { %p4370_p3 = scmp.ne.s32.totalorder %s4899_s7, %s4369_s20  ;;  %s4374_s12 = sshll.u32 %s4480_s6, 4  ;;  %s4375_s12 = int_to_ptr.vmem [resolvable:$false] %s4374_s12 }
 0x10d   : > { %s4376_s13 = scalar_lea.vmem %s4375_s12, 4096  ;;  %p4377_p8 = scmp.lt.s32.totalorder %s4899_s7, %s4375_s12 }
 0x10e   : > { %p4372_p2 = pnand %p4370_p3, %p5584_p1  ;;  %p4378_p4 = scmp.lt.s32.totalorder %s4376_s13, %s4369_s20 }
 0x110   : > { %p4373_p0 = pneg %p4372_p2  ;;  %p4379_p7 = por %p4378_p4, %p4377_p8 }
 0x112   : > { %p4380_p12 = pnand %p4379_p7, %p4373_p0 }
 0x114   : > { %4383 = shalt.err (!%p4380_p12)
}
 0x115   : > { %4045 = dma.hbm_to_vmem [thread:$0]  (!%p5585_p6), %s4895_s26, 2048, %s4899_s7, %s4756_s9, %s5580_s17, %s5580_s17, %s5579_s2  }
 0x116   : > { %p5587_p1 = scmp.ne.s32.totalorder %s5561_s30, 0 }
 0x117   : > { %s4929_s23 = sand.u32 (!%p5587_p1), 1, %s4458_s25   ;;  %p5588_p10 = scmp.ne.s32.totalorder (!%p5587_p1), %s5569_s21, 0 }
 0x118   : > { %651 = sbr.rel (%p5587_p1) target bundleno = 2426 (0x97a), region = 88  ;;  %s2909_s22 = sshll.u32 (!%p5587_p1), %s4929_s23, 6 }
 0x119   : > { %s654_s18 = scalar_lea.sflag (!%p5587_p1), [#allocation3], %s4929_s23  ;;  %s4933_s10 = scalar_lea.vmem (!%p5587_p1), [#allocation2], %s2909_s22 }
 0x11f   : > { %4429 = dma.done.wait (%p5588_p10), %s654_s18, 1024  }
 0x120   : > { %4431 = vsyncadd (%p5588_p10), %s654_s18, 4294966272  ;;  %s662_s9 = sand.u32 1, %s4596_s0   ;;  %s4940_s4 = scalar_lea.vmem [#allocation5], %s2909_s22 }
 0x121   : > { %s663_s30 = scalar_lea.sflag [#allocation6], %s662_s9 }
 0x122   : > { %4433 = dma.done.wait (%p5588_p10), %s663_s30, 3072  }
 0x123   : > { %4435 = vsyncadd (%p5588_p10), %s663_s30, 4294964224  ;;  %s2911_s2 = sshll.u32 %s4929_s23, 7  ;;  %p5589_p6 = scmp.eq.s32.totalorder %s4596_s0, 0 }
 0x124   : > { %s4947_s17 = scalar_lea.vmem [#allocation7], %s2911_s2 }
 0x125   : > { %4437 = dma.done.wait (%p5589_p6), [#allocation9], 4096   ;;  %p5590_p13 = pmov %p5589_p6 }
 0x126   : > { %p5591_p5 = pmov %p5589_p6 }
 0x127   : > { %4439 = vsyncadd (%p5590_p13), [#allocation9], 4294963200 }
 0x128   : > { %4441 = dma.done.wait (%p5591_p5), [#allocation12], 4096   ;;  %p5592_p9 = pmov %p5591_p5 }
 0x129   : > { %p5593_p11 = pmov %p5591_p5 }
 0x12a   : > { %4443 = vsyncadd (%p5592_p9), [#allocation12], 4294963200 }
 0x12b   : > { %4445 = dma.done.wait (%p5593_p11), [#allocation15], 4096   ;;  %p5594_p3 = pmov %p5591_p5 }
 0x12c   : > { %p774_p2 = scmp.lt.s32.totalorder %s4596_s0, 1  ;;  %s5595_s19 = sld [smem:[#allocation30_spill]]  ;;  %v5004_v11 = vld [vmem:[%s4933_s10] sm:$0xff]   ;;  %v5042_v25 = vld [vmem:[%s4933_s10 + $0x8] sm:$0xff]   ;;  %v5045_v26 = vld [vmem:[%s4933_s10 + $0x10] sm:$0xff]   ;;  %v4481_v32 = vmov 0.0|0.0  }
 0x12d   : > { %4447 = vsyncadd (%p5594_p3), [#allocation15], 4294963200  ;;  %3262 = vmatprep.mubr.bf16.mxu0 %v5004_v11  ;;  %v5050_v27 = vld [vmem:[%s4933_s10 + $0x18] sm:$0xff]   ;;  %v5053_v28 = vld [vmem:[%s4933_s10 + $0x20] sm:$0xff]   ;;  %3753 = vmatprep.subr.bf16.mxu1 %v4481_v32  ;;  %vm4482_vm0 = vmmov 0   ;;  %v4483_v33 = vmov 0.0  }
 0x12e   : > { %s4963_s21 = scalar_select %p774_p2, %s4596_s0, 1  ;;  %v5058_v29 = vld [vmem:[%s4933_s10 + $0x28] sm:$0xff]   ;;  %v5061_v30 = vld [vmem:[%s4933_s10 + $0x30] sm:$0xff]   ;;  %v5066_v31 = vld [vmem:[%s4933_s10 + $0x38] sm:$0xff]   ;;  %3310 = vmatprep.mubr.msk.f32.mxu1 %vm4482_vm0, %v4483_v33  ;;  %vm1061_vm1 = vcmask 64512  }
 0x12f   : > { %s5596_s13 = sld [smem:[#allocation33_spill]]  ;;  %v1271_v60 = vld [vmem:[#allocation10] sm:$0xff]  ;;  %v1272_v61 = vld [vmem:[#allocation10 + $0x8] sm:$0xff]  ;;  %v1273_v63 = vld [vmem:[#allocation10 + $0x10] sm:$0xff]  ;;  %s5597_s9 = sld [smem:[#allocation35_spill]] }
 0x130   : > { %s2968_s26 = sshll.u32 %s4963_s21, 7  ;;  %s2921_s29 = sshll.u32 %s4963_s21, 3  ;;  %v3777_v62 = vpack.c.bf16 %v1272_v61, %v1271_v60  ;;  %v1449_v60 = vld [vmem:[#allocation8 + $0x8] sm:$0xff]  ;;  %v1450_v61 = vld [vmem:[#allocation8 + $0x10] sm:$0xff] }
 0x131   : > { %s5131_s20 = scalar_lea.vmem %s5503_s3, %s2921_s29  ;;  %s2918_s29 = sshll.u32 %s4929_s23, 3 }
 0x132   : > { %s4971_s14 = scalar_lea.vmem %s5595_s19, %s2968_s26  ;;  %v821_v58 = vld [vmem:[%s5131_s20] sm:$0xff]  ;;  %s5600_s19 = sld [smem:[#allocation40_spill]] }
 0x133   : > { %v4974_v0 = vld [vmem:[%s4971_s14] sm:$0xff]  ;;  %v4977_v1 = vld [vmem:[%s4971_s14 + $0x8] sm:$0xff]  ;;  %v4980_v2 = vld [vmem:[%s4971_s14 + $0x10] sm:$0xff]  ;;  %s5602_s6 = sld [smem:[#allocation41_spill]]  ;;  %s2962_s12 = sshll.u32 %s4596_s0, 7 }
 0x134   : > { %v838_v3 = vpack.c.bf16 %v4977_v1, %v4974_v0  ;;  %v4985_v4 = vld [vmem:[%s4971_s14 + $0x18] sm:$0xff]  ;;  %v4990_v6 = vld [vmem:[%s4971_s14 + $0x20] sm:$0xff]  ;;  %v4993_v7 = vld [vmem:[%s4971_s14 + $0x28] sm:$0xff]  ;;  %s2671_s30 = scalar_lea.sflag [#allocation4], %s4929_s23  ;;  %s4484_s0 = smov [#allocation17]  }
 0x135   : > { %v839_v5 = vpack.c.bf16 %v4985_v4, %v4980_v2  ;;  %v4996_v8 = vld [vmem:[%s4971_s14 + $0x30] sm:$0xff]  ;;  %v840_v9 = vpack.c.bf16 %v4993_v7, %v4990_v6  ;;  %v5001_v10 = vld [vmem:[%s4971_s14 + $0x38] sm:$0xff]  ;;  %v5010_v13 = vld [vmem:[%s4971_s14 + $0x40] sm:$0xff]  ;;  %s5139_s22 = scalar_lea.vmem %s5596_s13, %s2968_s26  ;;  %s5599_s26 = sld [smem:[#allocation38_spill]] }
 0x136   : > { %3246 = vmatprep.subr.bf16.mxu0 %v838_v3  ;;  %v841_v12 = vpack.c.bf16 %v5001_v10, %v4996_v8  ;;  %v5013_v14 = vld [vmem:[%s4971_s14 + $0x48] sm:$0xff]  ;;  %v5016_v15 = vld [vmem:[%s4971_s14 + $0x50] sm:$0xff]  ;;  %v5021_v17 = vld [vmem:[%s4971_s14 + $0x58] sm:$0xff]  ;;  %s773_s13 = scalar_lea.vmem [#allocation17], %s2918_s29 }
 0x137   : > { %3247 = vmatpush3.bf16.msra.mxu0 %v838_v3  ;;  %v842_v16 = vpack.c.bf16 %v5013_v14, %v5010_v13  ;;  %v5024_v18 = vld [vmem:[%s4971_s14 + $0x60] sm:$0xff]  ;;  %v843_v19 = vpack.c.bf16 %v5021_v17, %v5016_v15  ;;  %v5029_v20 = vld [vmem:[%s4971_s14 + $0x68] sm:$0xff]  ;;  %v5034_v22 = vld [vmem:[%s4971_s14 + $0x70] sm:$0xff] }
 0x138   : > { %3248 = vmatprep.subr.bf16.mxu0 %v839_v5  ;;  %v844_v21 = vpack.c.bf16 %v5029_v20, %v5024_v18  ;;  %v5037_v23 = vld [vmem:[%s4971_s14 + $0x78] sm:$0xff]  ;;  %v822_v59 = vld [vmem:[%s5139_s22] sm:$0xff]  ;;  %s5601_s14 = sld [smem:[#allocation28_spill]] }
 0x139   : > { %v845_v24 = vpack.c.bf16 %v5037_v23, %v5034_v22  ;;  %v1274_v3 = vld [vmem:[#allocation10 + $0x18] sm:$0xff] }
 0x13b   : > { %3249 = vmatpush3.bf16.msra.mxu0 %v839_v5  ;;  %v3781_v5 = vpack.c.bf16 %v1274_v3, %v1273_v63 }
 0x13c   : > { %3250 = vmatprep.subr.bf16.mxu0 %v840_v9 }
 0x13e   : > { %p5604_p8 = scmp.ne.s32.totalorder %s5601_s14, 0 }
 0x13f   : > { %3251 = vmatpush3.bf16.msra.mxu0 %v840_v9  ;;  %v1275_v9 = vld [vmem:[#allocation10 + $0x20] sm:$0xff] }
 0x140   : > { %3252 = vmatprep.subr.bf16.mxu0 %v841_v12 }
 0x143   : > { %3253 = vmatpush3.bf16.msra.mxu0 %v841_v12  ;;  %v1276_v12 = vld [vmem:[#allocation10 + $0x28] sm:$0xff] }
 0x144   : > { %3254 = vmatprep.subr.bf16.mxu0 %v842_v16 }
 0x147   : > { %3255 = vmatpush3.bf16.msra.mxu0 %v842_v16  ;;  %v3785_v16 = vpack.c.bf16 %v1276_v12, %v1275_v9  ;;  %v824_v12 = vld [vmem:[%s5139_s22 + $0x10] sm:$0xff] }
 0x148   : > { %3256 = vmatprep.subr.bf16.mxu0 %v843_v19 }
 0x14b   : > { %3257 = vmatpush3.bf16.msra.mxu0 %v843_v19  ;;  %v1277_v19 = vld [vmem:[#allocation10 + $0x30] sm:$0xff] }
 0x14c   : > { %3258 = vmatprep.subr.bf16.mxu0 %v844_v21 }
 0x14f   : > { %3259 = vmatpush3.bf16.msra.mxu0 %v844_v21  ;;  %v1278_v21 = vld [vmem:[#allocation10 + $0x38] sm:$0xff] }
 0x150   : > { %3260 = vmatprep.subr.bf16.mxu0 %v845_v24 }
 0x153   : > { %3261 = vmatpush3.bf16.msra.mxu0 %v845_v24  ;;  %v3789_v24 = vpack.c.bf16 %v1278_v21, %v1277_v19  ;;  %v1452_v19 = vld [vmem:[#allocation8 + $0x20] sm:$0xff]  ;;  %v1453_v21 = vld [vmem:[#allocation8 + $0x28] sm:$0xff] }
 0x154   : > { %3778 = vmatprep.subr.bf16.mxu0 %v3777_v62 }
 0x156   : > { %3263 = vmatmul.mubr.bf16.vlgmr.msra.gmra.mrb[0].mxu0 %v5042_v25 }
 0x157   : > { %3266 = vmatprep.mubr.bf16.mxu0 %v5045_v26  ;;  %3780 = vmatpush3.bf16.msra.mxu0 %v3777_v62  ;;  %v1451_v62 = vld [vmem:[#allocation8 + $0x18] sm:$0xff] }
 0x158   : > { %3782 = vmatprep.subr.bf16.mxu0 %v3781_v5 }
 0x15b   : > { %3784 = vmatpush3.bf16.msra.mxu0 %v3781_v5  ;;  %v823_v5 = vld [vmem:[%s5139_s22 + $0x8] sm:$0xff] }
 0x15c   : > { %3786 = vmatprep.subr.bf16.mxu0 %v3785_v16 }
 0x15e   : > { %3267 = vmatmul.mubr.bf16.gmra.mrb[4].mxu0 %v5050_v27 }
 0x15f   : > { %3270 = vmatprep.mubr.bf16.mxu0 %v5053_v28  ;;  %3788 = vmatpush3.bf16.msra.mxu0 %v3785_v16  ;;  %v3813_v16 = vpack.c.bf16 %v1451_v62, %v1450_v61  ;;  %v1458_v62 = vld [vmem:[#allocation8 + $0x50] sm:$0xff] }
 0x160   : > { %3790 = vmatprep.subr.bf16.mxu0 %v3789_v24 }
 0x163   : > { %3792 = vmatpush3.bf16.msra.mxu0 %v3789_v24  ;;  %v825_v24 = vld [vmem:[%s5139_s22 + $0x18] sm:$0xff] }
 0x166   : > { %3271 = vmatmul.mubr.bf16.gmra.mrb[8].mxu0 %v5058_v29 }
 0x167   : > { %3274 = vmatprep.mubr.bf16.mxu0 %v5061_v30 }
 0x16e   : > { %3275 = vmatmul.mubr.bf16.gmra.mrb[12].mxu0 %v5066_v31 }
 0x229   : > { %v5072_v34 = vpop.f32.mrb[0].mxu0 }
 0x22a   : > { %v5074_v35 = vpop.f32.mrb[1].mxu0 }
 0x22b   : > { %v5076_v36 = vpop.f32.mrb[2].mxu0 }
 0x22c   : > { %v3757_v37 = vpack.c.bf16 %v5076_v36, %v5072_v34  ;;  %v5080_v38 = vpop.f32.mrb[3].mxu0 }
 0x22d   : > { %v3754_v39 = vpack.c.bf16 %v5080_v38, %v5074_v35 }
 0x22f   : > { %3755 = vmatpush3.bf16.msra.mxu1 %v3754_v39  ;;  %v1280_v39 = vld [vmem:[#allocation10 + $0x48] sm:$0xff] }
 0x230   : > { %3756 = vmatprep.subr.bf16.mxu1 %v4481_v32 }
 0x231   : > { %v5085_v40 = vpop.f32.mrb[4].mxu0 }
 0x232   : > { %v5087_v41 = vpop.f32.mrb[5].mxu0 }
 0x233   : > { %v5089_v42 = vpop.f32.mrb[6].mxu0  ;;  %3758 = vmatpush3.bf16.msra.mxu1 %v3757_v37  ;;  %v1279_v37 = vld [vmem:[#allocation10 + $0x40] sm:$0xff] }
 0x234   : > { %v3763_v43 = vpack.c.bf16 %v5089_v42, %v5085_v40  ;;  %v5093_v44 = vpop.f32.mrb[7].mxu0  ;;  %3759 = vmatprep.subr.bf16.mxu1 %v4481_v32 }
 0x235   : > { %v3760_v45 = vpack.c.bf16 %v5093_v44, %v5087_v41 }
 0x237   : > { %3761 = vmatpush3.bf16.msra.mxu1 %v3760_v45  ;;  %v1281_v45 = vld [vmem:[#allocation10 + $0x50] sm:$0xff] }
 0x238   : > { %3762 = vmatprep.subr.bf16.mxu1 %v4481_v32 }
 0x239   : > { %v5099_v46 = vpop.f32.mrb[8].mxu0 }
 0x23a   : > { %v5101_v47 = vpop.f32.mrb[9].mxu0 }
 0x23b   : > { %v5103_v48 = vpop.f32.mrb[10].mxu0  ;;  %3764 = vmatpush3.bf16.msra.mxu1 %v3763_v43  ;;  %v3793_v43 = vpack.c.bf16 %v1280_v39, %v1279_v37  ;;  %v826_v37 = vld [vmem:[%s5139_s22 + $0x20] sm:$0xff]  ;;  %v3817_v39 = vpack.c.bf16 %v1453_v21, %v1452_v19  ;;  %v833_v19 = vld [vmem:[%s5139_s22 + $0x58] sm:$0xff] }
 0x23c   : > { %v3769_v49 = vpack.c.bf16 %v5103_v48, %v5099_v46  ;;  %v5107_v50 = vpop.f32.mrb[11].mxu0  ;;  %3765 = vmatprep.subr.bf16.mxu1 %v4481_v32  ;;  %v834_v21 = vld [vmem:[%s5139_s22 + $0x60] sm:$0xff] }
 0x23d   : > { %v3766_v51 = vpack.c.bf16 %v5107_v50, %v5101_v47  ;;  %3794 = vmatprep.subr.bf16.mxu0 %v3793_v43 }
 0x23e   : > { %3796 = vmatpush3.bf16.msra.mxu0 %v3793_v43  ;;  %v1454_v43 = vld [vmem:[#allocation8 + $0x30] sm:$0xff] }
 0x23f   : > { %3767 = vmatpush3.bf16.msra.mxu1 %v3766_v51 }
 0x240   : > { %3768 = vmatprep.subr.bf16.mxu1 %v4481_v32 }
 0x241   : > { %v5113_v52 = vpop.f32.mrb[12].mxu0 }
 0x242   : > { %v5115_v53 = vpop.f32.mrb[13].mxu0 }
 0x243   : > { %v5117_v54 = vpop.f32.mrb[14].mxu0  ;;  %3770 = vmatpush3.bf16.msra.mxu1 %v3769_v49  ;;  %v1282_v49 = vld [vmem:[#allocation10 + $0x58] sm:$0xff] }
 0x244   : > { %v3775_v55 = vpack.c.bf16 %v5117_v54, %v5113_v52  ;;  %v5121_v56 = vpop.f32.mrb[15].mxu0  ;;  %3771 = vmatprep.subr.bf16.mxu1 %v4481_v32  ;;  %v3797_v51 = vpack.c.bf16 %v1282_v49, %v1281_v45  ;;  %v1455_v45 = vld [vmem:[#allocation8 + $0x38] sm:$0xff]  ;;  %v827_v49 = vld [vmem:[%s5139_s22 + $0x28] sm:$0xff] }
 0x245   : > { %v3772_v57 = vpack.c.bf16 %v5121_v56, %v5115_v53 }
 0x246   : > { %3798 = vmatprep.subr.bf16.mxu0 %v3797_v51 }
 0x247   : > { %3773 = vmatpush3.bf16.msra.mxu1 %v3772_v57  ;;  %v1284_v57 = vld [vmem:[#allocation10 + $0x68] sm:$0xff]  ;;  %3800 = vmatpush3.bf16.msra.mxu0 %v3797_v51  ;;  %v828_v51 = vld [vmem:[%s5139_s22 + $0x30] sm:$0xff] }
 0x248   : > { %3774 = vmatprep.subr.bf16.mxu1 %v4481_v32 }
 0x24b   : > { %3776 = vmatpush3.bf16.msra.mxu1 %v3775_v55  ;;  %v1283_v55 = vld [vmem:[#allocation10 + $0x60] sm:$0xff] }
 0x24e   : > { %3311 = vmatmul.mubr.f32.vlgmr.msra.gmra.mrb[0].mxu1 %v821_v58  ;;  %v3801_v58 = vpack.c.bf16 %v1284_v57, %v1283_v55  ;;  %v3821_v55 = vpack.c.bf16 %v1455_v45, %v1454_v43  ;;  %v1456_v57 = vld [vmem:[#allocation8 + $0x40] sm:$0xff]  ;;  %v837_v43 = vld [vmem:[%s5139_s22 + $0x78] sm:$0xff]  ;;  %v1285_v45 = vld [vmem:[#allocation10 + $0x70] sm:$0xff] }
 0x24f   : > { %3315 = vmatprep.mubr.msk.f32.mxu1 %vm1061_vm1, %v822_v59  ;;  %v1448_v59 = vld [vmem:[#allocation8] sm:$0xff] }
 0x250   : > { %3802 = vmatprep.subr.bf16.mxu0 %v3801_v58  ;;  %v3809_v63 = vpack.c.bf16 %v1449_v60, %v1448_v59  ;;  %v829_v59 = vld [vmem:[%s5139_s22 + $0x38] sm:$0xff]  ;;  %v830_v60 = vld [vmem:[%s5139_s22 + $0x40] sm:$0xff] }
 0x251   : > { %3804 = vmatpush3.bf16.msra.mxu0 %v3801_v58  ;;  %v1457_v58 = vld [vmem:[#allocation8 + $0x48] sm:$0xff] }
 0x252   : > { %v3825_v61 = vpack.c.bf16 %v1457_v58, %v1456_v57  ;;  %v1463_v57 = vld [vmem:[#allocation8 + $0x78] sm:$0xff] }
 0x321   : > { %v1057_v3 = vpop.f32.mrb[0].mxu1 }
 0x322   : > { %v3312_v9 = vpop.f32.mrb[1].mxu1  ;;  %3313 = vmatprep.subr.mxu1 %v1057_v3 }
 0x323   : > { %3314 = vmatpush3.msra.mxu1 %v1057_v3  ;;  %v831_v3 = vld [vmem:[%s5139_s22 + $0x48] sm:$0xff] }
 0x324   : > { %3316 = vmatmul.mubr.msk.f32.vlgmr.msra.gmra.mrb[2].mxu1 %vm1061_vm1, %v823_v5  ;;  %3810 = vmatprep.subr.bf16.mxu1 %v3809_v63  ;;  %v832_v5 = vld [vmem:[%s5139_s22 + $0x50] sm:$0xff] }
 0x325   : > { %3318 = vmatprep.mubr.msk.f32.mxu1 %vm1061_vm1, %v824_v12  ;;  %3812 = vmatpush3.bf16.msra.mxu1 %v3809_v63  ;;  %v1459_v63 = vld [vmem:[#allocation8 + $0x58] sm:$0xff]  ;;  %v1460_v12 = vld [vmem:[#allocation8 + $0x60] sm:$0xff] }
 0x326   : > { %3814 = vmatprep.subr.bf16.mxu1 %v3813_v16  ;;  %v3829_v9 = vpack.c.bf16 %v1459_v63, %v1458_v62 }
 0x328   : > { %3319 = vmatmul.mubr.msk.f32.gmra.mrb[4].mxu1 %vm1061_vm1, %v825_v24 }
 0x329   : > { %3321 = vmatprep.mubr.msk.f32.mxu1 %vm1061_vm1, %v826_v37  ;;  %3816 = vmatpush3.bf16.msra.mxu1 %v3813_v16  ;;  %v1461_v16 = vld [vmem:[#allocation8 + $0x68] sm:$0xff] }
 0x32a   : > { %3818 = vmatprep.subr.bf16.mxu1 %v3817_v39  ;;  %v3833_v24 = vpack.c.bf16 %v1461_v16, %v1460_v12  ;;  %v835_v37 = vld [vmem:[%s5139_s22 + $0x68] sm:$0xff] }
 0x32c   : > { %3322 = vmatmul.mubr.msk.f32.gmra.mrb[6].mxu1 %vm1061_vm1, %v827_v49  ;;  %v1286_v49 = vld [vmem:[#allocation10 + $0x78] sm:$0xff] }
 0x32d   : > { %3324 = vmatprep.mubr.msk.f32.mxu1 %vm1061_vm1, %v828_v51  ;;  %3820 = vmatpush3.bf16.msra.mxu1 %v3817_v39  ;;  %v836_v39 = vld [vmem:[%s5139_s22 + $0x70] sm:$0xff]  ;;  %s2684_s22 = sshll.u32 %s773_s13, 4  ;;  %s5458_s22 = int_to_ptr.vmem [resolvable:$true] %s2684_s22 }
 0x32e   : > { %3822 = vmatprep.subr.bf16.mxu1 %v3821_v55  ;;  %v1462_v51 = vld [vmem:[#allocation8 + $0x70] sm:$0xff]  ;;  %s4384_s2 = scalar_lea.vmem %s5458_s22, 128 }
 0x32f   : > { %v3837_v58 = vpack.c.bf16 %v1463_v57, %v1462_v51  ;;  %v1662_v57 = vld [vmem:[#allocation11 + $0x70] sm:$0xff]  ;;  %p4385_p0 = scmp.ne.s32.totalorder %s5458_s22, %s4384_s2 }
 0x330   : > { %3325 = vmatmul.mubr.msk.f32.gmra.mrb[8].mxu1 %vm1061_vm1, %v829_v59  ;;  %v1648_v59 = vld [vmem:[#allocation11] sm:$0xff] }
 0x331   : > { %3327 = vmatprep.mubr.msk.f32.mxu1 %vm1061_vm1, %v830_v60  ;;  %3824 = vmatpush3.bf16.msra.mxu1 %v3821_v55  ;;  %v3805_v55 = vpack.c.bf16 %v1286_v49, %v1285_v45  ;;  %v1649_v60 = vld [vmem:[#allocation11 + $0x8] sm:$0xff]  ;;  %p4386_p4 = pnand %p4385_p0, %p5604_p8 }
 0x332   : > { %3826 = vmatprep.subr.bf16.mxu1 %v3825_v61 }
 0x333   : > { %3806 = vmatprep.subr.bf16.mxu0 %v3805_v55  ;;  %p4387_p7 = pneg %p4386_p4 }
 0x334   : > { %3328 = vmatmul.mubr.msk.f32.gmra.mrb[10].mxu1 %vm1061_vm1, %v831_v3  ;;  %3808 = vmatpush3.bf16.msra.mxu0 %v3805_v55  ;;  %v1656_v3 = vld [vmem:[#allocation11 + $0x40] sm:$0xff] }
 0x335   : > { %3330 = vmatprep.mubr.msk.f32.mxu1 %vm1061_vm1, %v832_v5  ;;  %3828 = vmatpush3.bf16.msra.mxu1 %v3825_v61  ;;  %v3841_v61 = vpack.c.bf16 %v1649_v60, %v1648_v59 }
 0x336   : > { %3830 = vmatprep.subr.bf16.mxu1 %v3829_v9 }
 0x337   : > { %3842 = vmatprep.subr.bf16.mxu0 %v3841_v61 }
 0x338   : > { %3331 = vmatmul.mubr.msk.f32.gmra.mrb[12].mxu1 %vm1061_vm1, %v833_v19  ;;  %v1658_v19 = vld [vmem:[#allocation11 + $0x50] sm:$0xff] }
 0x339   : > { %3333 = vmatprep.mubr.msk.f32.mxu1 %vm1061_vm1, %v834_v21  ;;  %3832 = vmatpush3.bf16.msra.mxu1 %v3829_v9 }
 0x33a   : > { %3834 = vmatprep.subr.bf16.mxu1 %v3833_v24 }
 0x33c   : > { %3334 = vmatmul.mubr.msk.f32.gmra.mrb[14].mxu1 %vm1061_vm1, %v835_v37 }
 0x33d   : > { %3336 = vmatprep.mubr.msk.f32.mxu1 %vm1061_vm1, %v836_v39  ;;  %3836 = vmatpush3.bf16.msra.mxu1 %v3833_v24 }
 0x33e   : > { %3838 = vmatprep.subr.bf16.mxu1 %v3837_v58 }
 0x340   : > { %3337 = vmatmul.mubr.msk.f32.gmra.mrb[16].mxu1 %vm1061_vm1, %v837_v43  ;;  %v1660_v43 = vld [vmem:[#allocation11 + $0x60] sm:$0xff] }
 0x341   : > { %3427 = vmatprep.mubr.f32.mxu1 %v4974_v0  ;;  %3840 = vmatpush3.bf16.msra.mxu1 %v3837_v58 }
 0x344   : > { %3428 = vmatmul.mubr.f32.vlgmr.msra.gmra.mrb[18].mxu1 %v4977_v1  ;;  %v1650_v1 = vld [vmem:[#allocation11 + $0x10] sm:$0xff] }
 0x345   : > { %3430 = vmatprep.mubr.f32.mxu1 %v4980_v2  ;;  %v1651_v2 = vld [vmem:[#allocation11 + $0x18] sm:$0xff] }
 0x348   : > { %3431 = vmatmul.mubr.f32.gmra.mrb[20].mxu1 %v4985_v4 }
 0x349   : > { %3433 = vmatprep.mubr.f32.mxu1 %v4990_v6 }
 0x34c   : > { %3434 = vmatmul.mubr.f32.gmra.mrb[22].mxu1 %v4993_v7 }
 0x34d   : > { %3436 = vmatprep.mubr.f32.mxu1 %v4996_v8  ;;  %v3845_v8 = vpack.c.bf16 %v1651_v2, %v1650_v1  ;;  %v1634_v2 = vld [vmem:[%s4947_s17 + $0x10] sm:$0xff] }
 0x350   : > { %3437 = vmatmul.mubr.f32.gmra.mrb[24].mxu1 %v5001_v10 }
 0x351   : > { %3439 = vmatprep.mubr.f32.mxu1 %v5010_v13  ;;  %v1652_v13 = vld [vmem:[#allocation11 + $0x20] sm:$0xff] }
 0x354   : > { %3440 = vmatmul.mubr.f32.gmra.mrb[26].mxu1 %v5013_v14  ;;  %v1653_v14 = vld [vmem:[#allocation11 + $0x28] sm:$0xff] }
 0x355   : > { %3442 = vmatprep.mubr.f32.mxu1 %v5016_v15 }
 0x358   : > { %3443 = vmatmul.mubr.f32.gmra.mrb[28].mxu1 %v5021_v17 }
 0x359   : > { %3445 = vmatprep.mubr.f32.mxu1 %v5024_v18 }
 0x35c   : > { %3446 = vmatmul.mubr.f32.gmra.mrb[30].mxu1 %v5029_v20 }
 0x35d   : > { %3448 = vmatprep.mubr.f32.mxu1 %v5034_v22  ;;  %v1654_v22 = vld [vmem:[#allocation11 + $0x30] sm:$0xff] }
 0x360   : > { %3449 = vmatmul.mubr.f32.gmra.mrb[32].mxu1 %v5037_v23  ;;  %v1655_v23 = vld [vmem:[#allocation11 + $0x38] sm:$0xff] }
 0x361   : > { %3523 = vmatprep.mubr.bf16.mxu1 %v5004_v11  ;;  %v3849_v11 = vpack.c.bf16 %v1653_v14, %v1652_v13  ;;  %v1642_v13 = vld [vmem:[%s4947_s17 + $0x50] sm:$0xff]  ;;  %v1643_v14 = vld [vmem:[%s4947_s17 + $0x58] sm:$0xff] }
 0x3f7   : > { %v3317_v0 = vpop.f32.mrb[2].mxu1 }
 0x3f8   : > { %v1256_v4 = vadd.f32 %v3317_v0, %v5080_v38  ;;  %v1176_v6 = vpop.f32.mrb[3].mxu1 }
 0x3f9   : > { %v1255_v7 = vadd.f32 %v1176_v6, %v5074_v35  ;;  %v1638_v6 = vld [vmem:[%s4947_s17 + $0x30] sm:$0xff] }
 0x3fb   : > { %v3320_v10 = vpop.f32.mrb[4].mxu1  ;;  %3371 = vmatprep.mubr.f32.mxu0 %v1255_v7  ;;  %v1639_v7 = vld [vmem:[%s4947_s17 + $0x38] sm:$0xff] }
 0x3fc   : > { %v1258_v15 = vadd.f32 %v3320_v10, %v5076_v36  ;;  %v1186_v17 = vpop.f32.mrb[5].mxu1  ;;  %3372 = vmatmul.mubr.f32.vlgmr.msra.gmra.mrb[16].mxu0 %v1256_v4  ;;  %v3853_v36 = vpack.c.bf16 %v1655_v23, %v1654_v22  ;;  %v1637_v4 = vld [vmem:[%s4947_s17 + $0x28] sm:$0xff] }
 0x3fd   : > { %v1257_v18 = vadd.f32 %v5072_v34, %v1186_v17  ;;  %3844 = vmatpush3.bf16.msra.mxu0 %v3841_v61  ;;  %v1657_v34 = vld [vmem:[#allocation11 + $0x48] sm:$0xff] }
 0x3fe   : > { %3846 = vmatprep.subr.bf16.mxu0 %v3845_v8  ;;  %v1641_v10 = vld [vmem:[%s4947_s17 + $0x48] sm:$0xff] }
 0x3ff   : > { %v3323_v20 = vpop.f32.mrb[6].mxu1  ;;  %3374 = vmatprep.mubr.f32.mxu0 %v1257_v18  ;;  %v1645_v17 = vld [vmem:[%s4947_s17 + $0x68] sm:$0xff]  ;;  %v1646_v18 = vld [vmem:[%s4947_s17 + $0x70] sm:$0xff] }
 0x400   : > { %v1260_v35 = vadd.f32 %v3323_v20, %v5093_v44  ;;  %v1196_v38 = vpop.f32.mrb[7].mxu1  ;;  %3375 = vmatmul.mubr.f32.gmra.mrb[18].mxu0 %v1258_v15  ;;  %v3857_v44 = vpack.c.bf16 %v1657_v34, %v1656_v3  ;;  %v1644_v15 = vld [vmem:[%s4947_s17 + $0x60] sm:$0xff] }
 0x401   : > { %v1259_v62 = vadd.f32 %v1196_v38, %v5087_v41  ;;  %3848 = vmatpush3.bf16.msra.mxu0 %v3845_v8  ;;  %v1659_v41 = vld [vmem:[#allocation11 + $0x58] sm:$0xff]  ;;  %v1640_v8 = vld [vmem:[%s4947_s17 + $0x40] sm:$0xff] }
 0x402   : > { %3850 = vmatprep.subr.bf16.mxu0 %v3849_v11 }
 0x403   : > { %v3326_v63 = vpop.f32.mrb[8].mxu1  ;;  %3377 = vmatprep.mubr.f32.mxu0 %v1259_v62 }
 0x404   : > { %v1262_v5 = vadd.f32 %v3326_v63, %v5089_v42  ;;  %v1206_v9 = vpop.f32.mrb[9].mxu1  ;;  %3378 = vmatmul.mubr.f32.gmra.mrb[20].mxu0 %v1260_v35  ;;  %v3861_v42 = vpack.c.bf16 %v1659_v41, %v1658_v19  ;;  %v4117_v41 = vld [vmem:[%s4940_s4] sm:$0xff]  }
 0x405   : > { %v1261_v12 = vadd.f32 %v5085_v40, %v1206_v9  ;;  %3852 = vmatpush3.bf16.msra.mxu0 %v3849_v11  ;;  %v1661_v40 = vld [vmem:[#allocation11 + $0x68] sm:$0xff]  ;;  %v1647_v11 = vld [vmem:[%s4947_s17 + $0x78] sm:$0xff] }
 0x406   : > { %3854 = vmatprep.subr.bf16.mxu0 %v3853_v36 }
 0x407   : > { %v3329_v16 = vpop.f32.mrb[10].mxu1  ;;  %3380 = vmatprep.mubr.f32.mxu0 %v1261_v12 }
 0x408   : > { %v1264_v21 = vadd.f32 %v3329_v16, %v5107_v50  ;;  %v1216_v24 = vpop.f32.mrb[11].mxu1  ;;  %3381 = vmatmul.mubr.f32.gmra.mrb[22].mxu0 %v1262_v5  ;;  %v3865_v50 = vpack.c.bf16 %v1661_v40, %v1660_v43 }
 0x409   : > { %v1263_v37 = vadd.f32 %v1216_v24, %v5101_v47  ;;  %3856 = vmatpush3.bf16.msra.mxu0 %v3853_v36  ;;  %v1663_v47 = vld [vmem:[#allocation11 + $0x78] sm:$0xff] }
 0x40a   : > { %3858 = vmatprep.subr.bf16.mxu0 %v3857_v44 }
 0x40b   : > { %v3332_v39 = vpop.f32.mrb[12].mxu1  ;;  %3383 = vmatprep.mubr.f32.mxu0 %v1263_v37 }
 0x40c   : > { %v1266_v45 = vadd.f32 %v3332_v39, %v5103_v48  ;;  %v1226_v49 = vpop.f32.mrb[13].mxu1  ;;  %3384 = vmatmul.mubr.f32.gmra.mrb[24].mxu0 %v1264_v21  ;;  %v3869_v48 = vpack.c.bf16 %v1663_v47, %v1662_v57  ;;  %v5234_v21 = vld [vmem:[%s5597_s9] ss:$0 sm:$0xff] }
 0x40d   : > { %v1265_v51 = vadd.f32 %v5099_v46, %v1226_v49  ;;  %3860 = vmatpush3.bf16.msra.mxu0 %v3857_v44 }
 0x40e   : > { %3862 = vmatprep.subr.bf16.mxu0 %v3861_v42 }
 0x40f   : > { %v3335_v55 = vpop.f32.mrb[14].mxu1  ;;  %3386 = vmatprep.mubr.f32.mxu0 %v1265_v51 }
 0x410   : > { %v1268_v58 = vadd.f32 %v3335_v55, %v5121_v56  ;;  %v1236_v59 = vpop.f32.mrb[15].mxu1  ;;  %3387 = vmatmul.mubr.f32.gmra.mrb[26].mxu0 %v1266_v45  ;;  %v1633_v56 = vld [vmem:[%s4947_s17 + $0x8] sm:$0xff] }
 0x411   : > { %v1267_v60 = vadd.f32 %v1236_v59, %v5115_v53  ;;  %3864 = vmatpush3.bf16.msra.mxu0 %v3861_v42  ;;  %v1632_v53 = vld [vmem:[%s4947_s17] sm:$0xff] }
 0x412   : > { %3866 = vmatprep.subr.bf16.mxu0 %v3865_v50 }
 0x413   : > { %v3338_v46 = vpop.f32.mrb[16].mxu1  ;;  %3389 = vmatprep.mubr.f32.mxu0 %v1267_v60 }
 0x414   : > { %v1270_v61 = vadd.f32 %v3338_v46, %v5117_v54  ;;  %v1246_v0 = vpop.f32.mrb[17].mxu1  ;;  %3390 = vmatmul.mubr.f32.gmra.mrb[28].mxu0 %v1268_v58  ;;  %v1635_v54 = vld [vmem:[%s4947_s17 + $0x18] sm:$0xff] }
 0x415   : > { %v1269_v1 = vadd.f32 %v5113_v52, %v1246_v0  ;;  %3868 = vmatpush3.bf16.msra.mxu0 %v3865_v50  ;;  %v1636_v52 = vld [vmem:[%s4947_s17 + $0x20] sm:$0xff]  ;;  %s5598_s17 = sld [smem:[#allocation37_spill]] }
 0x416   : > { %3870 = vmatprep.subr.bf16.mxu0 %v3869_v48 }
 0x417   : > { %3392 = vmatprep.mubr.f32.mxu0 %v1269_v1  ;;  %v3429_v20 = vpop.f32.mrb[18].mxu1 }
 0x418   : > { %3393 = vmatmul.mubr.f32.gmra.mrb[30].mxu0 %v1270_v61  ;;  %v1537_v22 = vpop.f32.mrb[19].mxu1  ;;  %v1543_v24 = vadd.f32 %v3429_v20, %v5234_v21 }
 0x419   : > { %3872 = vmatpush3.bf16.msra.mxu0 %v3869_v48  ;;  %3483 = vmatprep.mubr.f32.mxu0 %v1632_v53  ;;  %v1538_v42 = vadd.f32 %v5234_v21, %v1537_v22 }
 0x41b   : > { %v3432_v23 = vpop.f32.mrb[20].mxu1 }
 0x41c   : > { %3484 = vmatmul.mubr.f32.vlgmr.msra.gmra.mrb[32].mxu0 %v1633_v56  ;;  %v1547_v35 = vpop.f32.mrb[21].mxu1  ;;  %v1553_v49 = vadd.f32 %v3432_v23, %v5234_v21 }
 0x41d   : > { %3486 = vmatprep.mubr.f32.mxu0 %v1634_v2  ;;  %v1548_v55 = vadd.f32 %v5234_v21, %v1547_v35 }
 0x41f   : > { %v3435_v38 = vpop.f32.mrb[22].mxu1 }
 0x420   : > { %3487 = vmatmul.mubr.f32.gmra.mrb[34].mxu0 %v1635_v54  ;;  %v1557_v62 = vpop.f32.mrb[23].mxu1  ;;  %v1563_v48 = vadd.f32 %v3435_v38, %v5234_v21 }
 0x421   : > { %3489 = vmatprep.mubr.f32.mxu0 %v1636_v52  ;;  %v1558_v0 = vadd.f32 %v5234_v21, %v1557_v62 }
 0x423   : > { %v3438_v36 = vpop.f32.mrb[24].mxu1 }
 0x424   : > { %3490 = vmatmul.mubr.f32.gmra.mrb[36].mxu0 %v1637_v4  ;;  %v1567_v63 = vpop.f32.mrb[25].mxu1  ;;  %v1573_v52 = vadd.f32 %v3438_v36, %v5234_v21 }
 0x425   : > { %3492 = vmatprep.mubr.f32.mxu0 %v1638_v6 }
 0x427   : > { %v3441_v3 = vpop.f32.mrb[26].mxu1 }
 0x428   : > { %3493 = vmatmul.mubr.f32.gmra.mrb[38].mxu0 %v1639_v7  ;;  %v1577_v34 = vpop.f32.mrb[27].mxu1  ;;  %v1568_v7 = vadd.f32 %v5234_v21, %v1567_v63 }
 0x429   : > { %3495 = vmatprep.mubr.f32.mxu0 %v1640_v8  ;;  %v1578_v20 = vadd.f32 %v5234_v21, %v1577_v34 }
 0x42b   : > { %v3444_v5 = vpop.f32.mrb[28].mxu1 }
 0x42c   : > { %3496 = vmatmul.mubr.f32.gmra.mrb[40].mxu0 %v1641_v10  ;;  %v1587_v9 = vpop.f32.mrb[29].mxu1  ;;  %v1593_v36 = vadd.f32 %v3444_v5, %v5234_v21 }
 0x42d   : > { %3498 = vmatprep.mubr.f32.mxu0 %v1642_v13  ;;  %v1588_v34 = vadd.f32 %v5234_v21, %v1587_v9 }
 0x42f   : > { %v5222_v12 = vpop.f32.mrb[30].mxu1 }
 0x430   : > { %3499 = vmatmul.mubr.f32.gmra.mrb[42].mxu0 %v1643_v14  ;;  %v5224_v44 = vpop.f32.mrb[31].mxu1  ;;  %v1603_v5 = vadd.f32 %v5222_v12, %v5234_v21 }
 0x431   : > { %3501 = vmatprep.mubr.f32.mxu0 %v1644_v15  ;;  %v1598_v9 = vadd.f32 %v5234_v21, %v5224_v44 }
 0x433   : > { %v5226_v16 = vpop.f32.mrb[32].mxu1 }
 0x434   : > { %3502 = vmatmul.mubr.f32.gmra.mrb[44].mxu0 %v1645_v17  ;;  %v5228_v19 = vpop.f32.mrb[33].mxu1  ;;  %v1583_v17 = vadd.f32 %v3441_v3, %v5234_v21  ;;  %v1613_v12 = vadd.f32 %v5226_v16, %v5234_v21  ;;  %v5327_v16 = vld [vmem:[%s5598_s17] ss:$0 sm:$0xff]  ;;  %s4388_s17 = sshll.u32 %s4484_s0, 4  ;;  %s4389_s17 = int_to_ptr.vmem [resolvable:$false] %s4388_s17 }
 0x435   : > { %3504 = vmatprep.mubr.f32.mxu0 %v1646_v18  ;;  %v1608_v44 = vadd.f32 %v5234_v21, %v5228_v19  ;;  %p4391_p12 = scmp.lt.s32.totalorder %s5458_s22, %s4389_s17 }
 0x438   : > { %3505 = vmatmul.mubr.f32.gmra.mrb[46].mxu0 %v1647_v11 }
 0x439   : > { %3555 = vmatprep.mubr.bf16.mxu0 %v4117_v41 }
 0x4cf   : > { %v3373_v37 = vpop.f32.mrb[16].mxu0 }
 0x4d0   : > { %v1433_v39 = vmax.f32 %v3373_v37, 0.0  ;;  %v1353_v43 = vpop.f32.mrb[17].mxu0 }
 0x4d1   : > { %v1432_v40 = vmax.f32 %v1353_v43, 0.0 }
 0x4d2   : > { %v5238_v45 = vadd.f32 %v1543_v24, %v1433_v39 }
 0x4d3   : > { %v5241_v51 = vadd.f32 %v1538_v42, %v1432_v40  ;;  %v3376_v50 = vpop.f32.mrb[18].mxu0 }
 0x4d4   : > { %v1435_v57 = vmax.f32 %v3376_v50, 0.0  ;;  %v1363_v47 = vpop.f32.mrb[19].mxu0 }
 0x4d5   : > { %v5246_v58 = vpack.c.bf16 %v5238_v45, %v5241_v51  ;;  %v1434_v59 = vmax.f32 %v1363_v47, 0.0 }
 0x4d6   : > { %v5248_v60 = vadd.f32 %v1553_v49, %v1435_v57 }
 0x4d7   : > { %v5251_v46 = vadd.f32 %v1548_v55, %v1434_v59  ;;  %v3379_v61 = vpop.f32.mrb[20].mxu0  ;;  %3507 = vmatprep.subr.bf16.mxu1 %v5246_v58 }
 0x4d8   : > { %v1437_v1 = vmax.f32 %v3379_v61, 0.0  ;;  %v1373_v53 = vpop.f32.mrb[21].mxu0  ;;  %3508 = vmatpush3.bf16.msra.mxu1 %v5246_v58 }
 0x4d9   : > { %v5258_v56 = vpack.c.bf16 %v5248_v60, %v5251_v46  ;;  %v1436_v2 = vmax.f32 %v1373_v53, 0.0 }
 0x4da   : > { %v5260_v54 = vadd.f32 %v1563_v48, %v1437_v1 }
 0x4db   : > { %v5263_v4 = vadd.f32 %v1558_v0, %v1436_v2  ;;  %v3382_v6 = vpop.f32.mrb[22].mxu0  ;;  %3509 = vmatprep.subr.bf16.mxu1 %v5258_v56 }
 0x4dc   : > { %v1439_v8 = vmax.f32 %v3382_v6, 0.0  ;;  %v1383_v10 = vpop.f32.mrb[23].mxu0  ;;  %3510 = vmatpush3.bf16.msra.mxu1 %v5258_v56 }
 0x4dd   : > { %v5270_v13 = vpack.c.bf16 %v5260_v54, %v5263_v4  ;;  %v1438_v14 = vmax.f32 %v1383_v10, 0.0 }
 0x4de   : > { %v5272_v15 = vadd.f32 %v1573_v52, %v1439_v8 }
 0x4df   : > { %v5275_v18 = vadd.f32 %v1568_v7, %v1438_v14  ;;  %v3385_v11 = vpop.f32.mrb[24].mxu0  ;;  %3511 = vmatprep.subr.bf16.mxu1 %v5270_v13 }
 0x4e0   : > { %v1441_v22 = vmax.f32 %v3385_v11, 0.0  ;;  %v1393_v23 = vpop.f32.mrb[25].mxu0  ;;  %3512 = vmatpush3.bf16.msra.mxu1 %v5270_v13 }
 0x4e1   : > { %v5282_v35 = vpack.c.bf16 %v5272_v15, %v5275_v18  ;;  %v1440_v38 = vmax.f32 %v1393_v23, 0.0 }
 0x4e2   : > { %v5284_v62 = vadd.f32 %v1583_v17, %v1441_v22 }
 0x4e3   : > { %v5287_v63 = vadd.f32 %v1578_v20, %v1440_v38  ;;  %v3388_v3 = vpop.f32.mrb[26].mxu0  ;;  %3513 = vmatprep.subr.bf16.mxu1 %v5282_v35 }
 0x4e4   : > { %v1443_v41 = vmax.f32 %v3388_v3, 0.0  ;;  %v1403_v24 = vpop.f32.mrb[27].mxu0  ;;  %3514 = vmatpush3.bf16.msra.mxu1 %v5282_v35 }
 0x4e5   : > { %v5294_v37 = vpack.c.bf16 %v5284_v62, %v5287_v63  ;;  %v1442_v42 = vmax.f32 %v1403_v24, 0.0 }
 0x4e6   : > { %v5296_v39 = vadd.f32 %v1593_v36, %v1443_v41 }
 0x4e7   : > { %v5300_v43 = vadd.f32 %v1588_v34, %v1442_v42  ;;  %v3391_v40 = vpop.f32.mrb[28].mxu0  ;;  %3515 = vmatprep.subr.bf16.mxu1 %v5294_v37 }
 0x4e8   : > { %v1445_v49 = vmax.f32 %v3391_v40, 0.0  ;;  %v1413_v50 = vpop.f32.mrb[29].mxu0  ;;  %3516 = vmatpush3.bf16.msra.mxu1 %v5294_v37 }
 0x4e9   : > { %v5308_v55 = vpack.c.bf16 %v5296_v39, %v5300_v43  ;;  %v1444_v57 = vmax.f32 %v1413_v50, 0.0 }
 0x4ea   : > { %v5310_v47 = vadd.f32 %v1603_v5, %v1445_v49 }
 0x4eb   : > { %v5314_v59 = vadd.f32 %v1598_v9, %v1444_v57  ;;  %v3394_v48 = vpop.f32.mrb[30].mxu0  ;;  %3517 = vmatprep.subr.bf16.mxu1 %v5308_v55 }
 0x4ec   : > { %v1447_v61 = vmax.f32 %v3394_v48, 0.0  ;;  %v1423_v0 = vpop.f32.mrb[31].mxu0  ;;  %3518 = vmatpush3.bf16.msra.mxu1 %v5308_v55 }
 0x4ed   : > { %v5322_v1 = vpack.c.bf16 %v5310_v47, %v5314_v59  ;;  %v1446_v53 = vmax.f32 %v1423_v0, 0.0 }
 0x4ee   : > { %v5329_v2 = vadd.f32 %v1613_v12, %v1447_v61 }
 0x4ef   : > { %v5331_v52 = vadd.f32 %v1608_v44, %v1446_v53  ;;  %v3485_v6 = vpop.f32.mrb[32].mxu0  ;;  %3519 = vmatprep.subr.bf16.mxu1 %v5322_v1 }
 0x4f0   : > { %v1743_v19 = vadd.f32 %v3485_v6, %v5327_v16  ;;  %v1737_v21 = vpop.f32.mrb[33].mxu0  ;;  %3520 = vmatpush3.bf16.msra.mxu1 %v5322_v1 }
 0x4f1   : > { %v5338_v7 = vpack.c.bf16 %v5329_v2, %v5331_v52  ;;  %v1738_v8 = vadd.f32 %v5327_v16, %v1737_v21 }
 0x4f3   : > { %v1969_v10 = vpack.c.bf16 %v1743_v19, %v1738_v8  ;;  %v3488_v14 = vpop.f32.mrb[34].mxu0  ;;  %3521 = vmatprep.subr.bf16.mxu1 %v5338_v7 }
 0x4f4   : > { %v1753_v17 = vadd.f32 %v3488_v14, %v5327_v16  ;;  %v1747_v11 = vpop.f32.mrb[35].mxu0  ;;  %3522 = vmatpush3.bf16.msra.mxu1 %v5338_v7  ;;  %v4119_v14 = vld [vmem:[%s4940_s4 + $0x10] sm:$0xff]  }
 0x4f5   : > { %v1748_v20 = vadd.f32 %v5327_v16, %v1747_v11  ;;  %3539 = vmatprep.subr.bf16.mxu0 %v1969_v10  ;;  %v4121_v11 = vld [vmem:[%s4940_s4 + $0x20] sm:$0xff]  }
 0x4f6   : > { %3540 = vmatpush3.bf16.msra.mxu0 %v1969_v10 }
 0x4f7   : > { %v1970_v22 = vpack.c.bf16 %v1753_v17, %v1748_v20  ;;  %v3491_v23 = vpop.f32.mrb[36].mxu0  ;;  %3524 = vmatmul.mubr.bf16.vlgmr.msra.gmra.mrb[36].mxu1 %v5042_v25  ;;  %v4120_v17 = vld [vmem:[%s4940_s4 + $0x18] sm:$0xff]   ;;  %v4122_v20 = vld [vmem:[%s4940_s4 + $0x28] sm:$0xff]  }
 0x4f8   : > { %v1763_v38 = vadd.f32 %v3491_v23, %v5327_v16  ;;  %v1757_v36 = vpop.f32.mrb[37].mxu0  ;;  %3527 = vmatprep.mubr.bf16.mxu1 %v5045_v26  ;;  %v2138_v23 = vld [vmem:[#allocation13] sm:$0xff] }
 0x4f9   : > { %v1758_v3 = vadd.f32 %v5327_v16, %v1757_v36  ;;  %3541 = vmatprep.subr.bf16.mxu0 %v1970_v22 }
 0x4fa   : > { %3542 = vmatpush3.bf16.msra.mxu0 %v1970_v22  ;;  %v4123_v22 = vld [vmem:[%s4940_s4 + $0x30] sm:$0xff]  }
 0x4fb   : > { %v1971_v34 = vpack.c.bf16 %v1763_v38, %v1758_v3  ;;  %v3494_v41 = vpop.f32.mrb[38].mxu0  ;;  %v2139_v38 = vld [vmem:[#allocation13 + $0x8] sm:$0xff]  ;;  %v2141_v3 = vld [vmem:[#allocation13 + $0x18] sm:$0xff] }
 0x4fc   : > { %v1773_v24 = vadd.f32 %v3494_v41, %v5327_v16  ;;  %v1767_v42 = vpop.f32.mrb[39].mxu0  ;;  %v3873_v36 = vpack.c.bf16 %v2139_v38, %v2138_v23  ;;  %v2142_v41 = vld [vmem:[#allocation13 + $0x20] sm:$0xff]  ;;  %v2332_v38 = vld [vmem:[#allocation14 + $0x50] sm:$0xff] }
 0x4fd   : > { %v1768_v5 = vadd.f32 %v5327_v16, %v1767_v42  ;;  %3543 = vmatprep.subr.bf16.mxu0 %v1971_v34 }
 0x4fe   : > { %3544 = vmatpush3.bf16.msra.mxu0 %v1971_v34  ;;  %3874 = vmatprep.subr.bf16.mxu1 %v3873_v36 }
 0x4ff   : > { %v1972_v40 = vpack.c.bf16 %v1773_v24, %v1768_v5  ;;  %v3497_v25 = vpop.f32.mrb[40].mxu0  ;;  %3528 = vmatmul.mubr.bf16.gmra.mrb[40].mxu1 %v5050_v27  ;;  %v2143_v24 = vld [vmem:[#allocation13 + $0x28] sm:$0xff]  ;;  %v2144_v5 = vld [vmem:[#allocation13 + $0x30] sm:$0xff] }
 0x500   : > { %v1783_v9 = vadd.f32 %v3497_v25, %v5327_v16  ;;  %v1777_v26 = vpop.f32.mrb[41].mxu0  ;;  %3531 = vmatprep.mubr.bf16.mxu1 %v5053_v28  ;;  %3876 = vmatpush3.bf16.msra.mxu1 %v3873_v36  ;;  %v3881_v42 = vpack.c.bf16 %v2143_v24, %v2142_v41  ;;  %v2333_v36 = vld [vmem:[#allocation14 + $0x58] sm:$0xff]  ;;  %v1923_v24 = vunpack.c.l.bf16 %v5258_v56 }
 0x501   : > { %v1778_v49 = vadd.f32 %v5327_v16, %v1777_v26  ;;  %3545 = vmatprep.subr.bf16.mxu0 %v1972_v40  ;;  %v2147_v26 = vld [vmem:[#allocation13 + $0x48] sm:$0xff] }
 0x502   : > { %3546 = vmatpush3.bf16.msra.mxu0 %v1972_v40  ;;  %v2145_v40 = vld [vmem:[#allocation13 + $0x38] sm:$0xff] }
 0x503   : > { %v1973_v50 = vpack.c.bf16 %v1783_v9, %v1778_v49  ;;  %v3500_v57 = vpop.f32.mrb[42].mxu0  ;;  %v3885_v25 = vpack.c.bf16 %v2145_v40, %v2144_v5  ;;  %v2146_v9 = vld [vmem:[#allocation13 + $0x40] sm:$0xff]  ;;  %v1921_v5 = vunpack.c.l.bf16 %v5246_v58 }
 0x504   : > { %v1793_v12 = vadd.f32 %v3500_v57, %v5327_v16  ;;  %v1787_v48 = vpop.f32.mrb[43].mxu0  ;;  %v3889_v49 = vpack.c.bf16 %v2147_v26, %v2146_v9  ;;  %v2149_v57 = vld [vmem:[#allocation13 + $0x58] sm:$0xff]  ;;  %v1924_v9 = vunpack.c.h.bf16 %v5258_v56  ;;  %v1926_v56 = vunpack.c.h.bf16 %v5270_v13 }
 0x505   : > { %v1788_v44 = vadd.f32 %v5327_v16, %v1787_v48  ;;  %3547 = vmatprep.subr.bf16.mxu0 %v1973_v50  ;;  %v2150_v48 = vld [vmem:[#allocation13 + $0x60] sm:$0xff] }
 0x506   : > { %3548 = vmatpush3.bf16.msra.mxu0 %v1973_v50  ;;  %v2148_v50 = vld [vmem:[#allocation13 + $0x50] sm:$0xff] }
 0x507   : > { %v1974_v61 = vpack.c.bf16 %v1793_v12, %v1788_v44  ;;  %v3503_v27 = vpop.f32.mrb[44].mxu0  ;;  %3532 = vmatmul.mubr.bf16.gmra.mrb[44].mxu1 %v5058_v29  ;;  %v3893_v12 = vpack.c.bf16 %v2149_v57, %v2148_v50  ;;  %v2151_v44 = vld [vmem:[#allocation13 + $0x68] sm:$0xff]  ;;  %v1922_v50 = vunpack.c.h.bf16 %v5246_v58  ;;  %v1931_v58 = vunpack.c.l.bf16 %v5308_v55 }
 0x508   : > { %v1803_v0 = vadd.f32 %v3503_v27, %v5327_v16  ;;  %v1797_v28 = vpop.f32.mrb[45].mxu0  ;;  %3535 = vmatprep.mubr.bf16.mxu1 %v5061_v30  ;;  %v4118_v30 = vld [vmem:[%s4940_s4 + $0x8] sm:$0xff]   ;;  %v2152_v27 = vld [vmem:[#allocation13 + $0x70] sm:$0xff] }
 0x509   : > { %v1798_v53 = vadd.f32 %v5327_v16, %v1797_v28  ;;  %3549 = vmatprep.subr.bf16.mxu0 %v1974_v61 }
 0x50a   : > { %3550 = vmatpush3.bf16.msra.mxu0 %v1974_v61  ;;  %v3897_v61 = vpack.c.bf16 %v2151_v44, %v2150_v48  ;;  %v1927_v44 = vunpack.c.l.bf16 %v5282_v35 }
 0x50b   : > { %v1975_v6 = vpack.c.bf16 %v1803_v0, %v1798_v53  ;;  %v3506_v19 = vpop.f32.mrb[46].mxu0  ;;  %v2153_v0 = vld [vmem:[#allocation13 + $0x78] sm:$0xff]  ;;  %v2322_v53 = vld [vmem:[#allocation14] sm:$0xff] }
 0x50c   : > { %v1813_v21 = vadd.f32 %v3506_v19, %v5327_v16  ;;  %v1807_v8 = vpop.f32.mrb[47].mxu0  ;;  %v3901_v28 = vpack.c.bf16 %v2153_v0, %v2152_v27  ;;  %v2324_v19 = vld [vmem:[#allocation14 + $0x10] sm:$0xff]  ;;  %v1925_v27 = vunpack.c.l.bf16 %v5270_v13  ;;  %v1935_v13 = vunpack.c.l.bf16 %v5338_v7 }
 0x50d   : > { %v1808_v29 = vadd.f32 %v5327_v16, %v1807_v8  ;;  %3551 = vmatprep.subr.bf16.mxu0 %v1975_v6  ;;  %v4124_v16 = vld [vmem:[%s4940_s4 + $0x38] sm:$0xff]   ;;  %s4390_s4 = scalar_lea.vmem %s4389_s17, 256 }
 0x50e   : > { %3552 = vmatpush3.bf16.msra.mxu0 %v1975_v6  ;;  %v2323_v6 = vld [vmem:[#allocation14 + $0x8] sm:$0xff]  ;;  %v2325_v8 = vld [vmem:[#allocation14 + $0x18] sm:$0xff]  ;;  %p4392_p1 = scmp.lt.s32.totalorder %s4390_s4, %s4384_s2 }
 0x50f   : > { %v1976_v10 = vpack.c.bf16 %v1813_v21, %v1808_v29  ;;  %3536 = vmatmul.mubr.bf16.gmra.mrb[48].mxu1 %v5066_v31  ;;  %v2140_v31 = vld [vmem:[#allocation13 + $0x10] sm:$0xff]  ;;  %v3905_v21 = vpack.c.bf16 %v2323_v6, %v2322_v53  ;;  %v3909_v29 = vpack.c.bf16 %v2325_v8, %v2324_v19  ;;  %v1928_v53 = vunpack.c.h.bf16 %v5282_v35 }
 0x510   : > { %v3877_v34 = vpack.c.bf16 %v2141_v3, %v2140_v31  ;;  %v3925_v31 = vpack.c.bf16 %v2333_v36, %v2332_v38  ;;  %v2334_v3 = vld [vmem:[#allocation14 + $0x60] sm:$0xff]  ;;  %v1930_v35 = vunpack.c.h.bf16 %v5294_v37  ;;  %p4393_p10 = por %p4392_p1, %p4391_p12 }
 0x511   : > { %3553 = vmatprep.subr.bf16.mxu0 %v1976_v10 }
 0x512   : > { %3554 = vmatpush3.bf16.msra.mxu0 %v1976_v10  ;;  %3878 = vmatprep.subr.bf16.mxu1 %v3877_v34  ;;  %v2326_v10 = vld [vmem:[#allocation14 + $0x20] sm:$0xff]  ;;  %p4394_p6 = pnand %p4393_p10, %p4387_p7 }
 0x513   : > { %3880 = vmatpush3.bf16.msra.mxu1 %v3877_v34  ;;  %3906 = vmatprep.subr.bf16.mxu0 %v3905_v21  ;;  %v2335_v34 = vld [vmem:[#allocation14 + $0x68] sm:$0xff] }
 0x514   : > { %3882 = vmatprep.subr.bf16.mxu1 %v3881_v42  ;;  %v3929_v41 = vpack.c.bf16 %v2335_v34, %v2334_v3 }
 0x515   : > { %3556 = vmatmul.mubr.bf16.vlgmr.msra.gmra.mrb[48].mxu0 %v4118_v30  ;;  %v2327_v30 = vld [vmem:[#allocation14 + $0x28] sm:$0xff] }
 0x516   : > { %3559 = vmatprep.mubr.bf16.mxu0 %v4119_v14  ;;  %3908 = vmatpush3.bf16.msra.mxu0 %v3905_v21  ;;  %v3913_v14 = vpack.c.bf16 %v2327_v30, %v2326_v10  ;;  %v1929_v30 = vunpack.c.l.bf16 %v5294_v37 }
 0x517   : > { %3884 = vmatpush3.bf16.msra.mxu1 %v3881_v42  ;;  %3910 = vmatprep.subr.bf16.mxu0 %v3909_v29 }
 0x518   : > { %3886 = vmatprep.subr.bf16.mxu1 %v3885_v25 }
 0x51a   : > { %3912 = vmatpush3.bf16.msra.mxu0 %v3909_v29 }
 0x51b   : > { %3888 = vmatpush3.bf16.msra.mxu1 %v3885_v25  ;;  %3914 = vmatprep.subr.bf16.mxu0 %v3913_v14 }
 0x51c   : > { %3890 = vmatprep.subr.bf16.mxu1 %v3889_v49 }
 0x51d   : > { %3560 = vmatmul.mubr.bf16.gmra.mrb[52].mxu0 %v4120_v17  ;;  %v2328_v17 = vld [vmem:[#allocation14 + $0x30] sm:$0xff] }
 0x51e   : > { %3563 = vmatprep.mubr.bf16.mxu0 %v4121_v11  ;;  %v2329_v11 = vld [vmem:[#allocation14 + $0x38] sm:$0xff]  ;;  %3916 = vmatpush3.bf16.msra.mxu0 %v3913_v14 }
 0x51f   : > { %3892 = vmatpush3.bf16.msra.mxu1 %v3889_v49 }
 0x520   : > { %3894 = vmatprep.subr.bf16.mxu1 %v3893_v12 }
 0x523   : > { %3896 = vmatpush3.bf16.msra.mxu1 %v3893_v12 }
 0x524   : > { %3898 = vmatprep.subr.bf16.mxu1 %v3897_v61 }
 0x525   : > { %3564 = vmatmul.mubr.bf16.gmra.mrb[56].mxu0 %v4122_v20  ;;  %v3917_v20 = vpack.c.bf16 %v2329_v11, %v2328_v17  ;;  %v1932_v11 = vunpack.c.h.bf16 %v5308_v55  ;;  %v1934_v55 = vunpack.c.h.bf16 %v5322_v1 }
 0x526   : > { %3567 = vmatprep.mubr.bf16.mxu0 %v4123_v22  ;;  %v2330_v22 = vld [vmem:[#allocation14 + $0x40] sm:$0xff] }
 0x527   : > { %3900 = vmatpush3.bf16.msra.mxu1 %v3897_v61  ;;  %3918 = vmatprep.subr.bf16.mxu0 %v3917_v20 }
 0x528   : > { %3902 = vmatprep.subr.bf16.mxu1 %v3901_v28  ;;  %3920 = vmatpush3.bf16.msra.mxu0 %v3917_v20 }
 0x52b   : > { %3904 = vmatpush3.bf16.msra.mxu1 %v3901_v28 }
 0x52c   : > { %3937 = vmatprep.subr.bf16.mxu1 %v4481_v32 }
 0x52d   : > { %3568 = vmatmul.mubr.bf16.gmra.mrb[60].mxu0 %v4124_v16  ;;  %v2331_v16 = vld [vmem:[#allocation14 + $0x48] sm:$0xff] }
 0x52e   : > { %v3921_v23 = vpack.c.bf16 %v2331_v16, %v2330_v22 }
 0x530   : > { %3922 = vmatprep.subr.bf16.mxu0 %v3921_v23 }
 0x531   : > { %3924 = vmatpush3.bf16.msra.mxu0 %v3921_v23 }
 0x532   : > { %3926 = vmatprep.subr.bf16.mxu0 %v3925_v31 }
 0x535   : > { %3928 = vmatpush3.bf16.msra.mxu0 %v3925_v31  ;;  %v1933_v31 = vunpack.c.l.bf16 %v5322_v1 }
 0x536   : > { %3930 = vmatprep.subr.bf16.mxu0 %v3929_v41 }
 0x539   : > { %3932 = vmatpush3.bf16.msra.mxu0 %v3929_v41  ;;  %v1936_v41 = vunpack.c.h.bf16 %v5338_v7 }
 0x5ca   : > { %v3525_v42 = vpop.f32.mrb[36].mxu1 }
 0x5cb   : > { %v1939_v40 = vsub.f32 %v3525_v42, %v1923_v24  ;;  %v1858_v25 = vpop.f32.mrb[37].mxu1 }
 0x5cc   : > { %v1937_v26 = vsub.f32 %v1858_v25, %v1921_v5  ;;  %v3526_v49 = vpop.f32.mrb[38].mxu1 }
 0x5cd   : > { %v1940_v57 = vsub.f32 %v3526_v49, %v1924_v9  ;;  %v1861_v12 = vpop.f32.mrb[39].mxu1 }
 0x5ce   : > { %v1938_v48 = vsub.f32 %v1861_v12, %v1922_v50 }
 0x5d2   : > { %v3529_v61 = vpop.f32.mrb[40].mxu1 }
 0x5d3   : > { %v1943_v0 = vsub.f32 %v3529_v61, %v1927_v44  ;;  %v1874_v28 = vpop.f32.mrb[41].mxu1 }
 0x5d4   : > { %v1941_v6 = vsub.f32 %v1874_v28, %v1925_v27  ;;  %v3530_v19 = vpop.f32.mrb[42].mxu1 }
 0x5d5   : > { %v1944_v21 = vsub.f32 %v3530_v19, %v1928_v53  ;;  %v1877_v8 = vpop.f32.mrb[43].mxu1 }
 0x5d6   : > { %v1942_v29 = vsub.f32 %v1877_v8, %v1926_v56 }
 0x5da   : > { %v3533_v10 = vpop.f32.mrb[44].mxu1 }
 0x5db   : > { %v1947_v14 = vsub.f32 %v3533_v10, %v1931_v58  ;;  %v1890_v17 = vpop.f32.mrb[45].mxu1 }
 0x5dc   : > { %v1945_v20 = vsub.f32 %v1890_v17, %v1929_v30  ;;  %v3534_v22 = vpop.f32.mrb[46].mxu1 }
 0x5dd   : > { %v1948_v16 = vsub.f32 %v3534_v22, %v1932_v11  ;;  %v1893_v23 = vpop.f32.mrb[47].mxu1 }
 0x5de   : > { %v1946_v38 = vsub.f32 %v1893_v23, %v1930_v35 }
 0x5e2   : > { %v3537_v36 = vpop.f32.mrb[48].mxu1 }
 0x5e3   : > { %v1951_v3 = vsub.f32 %v3537_v36, %v1935_v13  ;;  %v1906_v34 = vpop.f32.mrb[49].mxu1 }
 0x5e4   : > { %v1949_v24 = vsub.f32 %v1906_v34, %v1933_v31  ;;  %v3538_v42 = vpop.f32.mrb[50].mxu1 }
 0x5e5   : > { %v1952_v5 = vsub.f32 %v3538_v42, %v1936_v41  ;;  %v1909_v25 = vpop.f32.mrb[51].mxu1 }
 0x5e6   : > { %v1950_v9 = vsub.f32 %v1909_v25, %v1934_v55 }
 0x5e8   : > { %v3557_v37 = vpop.f32.mrb[48].mxu0 }
 0x5e9   : > { %v2124_v49 = vadd.f32 %v3557_v37, %v1939_v40  ;;  %v2059_v50 = vpop.f32.mrb[49].mxu0 }
 0x5ea   : > { %v2122_v12 = vadd.f32 %v2059_v50, %v1937_v26  ;;  %v3558_v44 = vpop.f32.mrb[50].mxu0 }
 0x5eb   : > { %v2125_v61 = vadd.f32 %v3558_v44, %v1940_v57  ;;  %v2062_v27 = vpop.f32.mrb[51].mxu0 }
 0x5ec   : > { %v2123_v28 = vadd.f32 %v2062_v27, %v1938_v48  ;;  %3603 = vmatprep.mubr.f32.mxu1 %v2122_v12 }
 0x5ee   : > { %3604 = vmatmul.mubr.f32.vlgmr.msra.gmra.mrb[34].mxu1 %v2123_v28 }
 0x5ef   : > { %3606 = vmatprep.mubr.f32.mxu1 %v2124_v49 }
 0x5f0   : > { %v3561_v53 = vpop.f32.mrb[52].mxu0 }
 0x5f1   : > { %v2128_v7 = vadd.f32 %v3561_v53, %v1943_v0  ;;  %v2075_v19 = vpop.f32.mrb[53].mxu0 }
 0x5f2   : > { %v2126_v56 = vadd.f32 %v2075_v19, %v1941_v6  ;;  %v3562_v8 = vpop.f32.mrb[54].mxu0  ;;  %3607 = vmatmul.mubr.f32.gmra.mrb[52].mxu1 %v2125_v61 }
 0x5f3   : > { %v2129_v1 = vadd.f32 %v3562_v8, %v1944_v21  ;;  %v2078_v58 = vpop.f32.mrb[55].mxu0 }
 0x5f4   : > { %v2127_v10 = vadd.f32 %v2078_v58, %v1942_v29  ;;  %3609 = vmatprep.mubr.f32.mxu1 %v2126_v56 }
 0x5f6   : > { %3610 = vmatmul.mubr.f32.gmra.mrb[54].mxu1 %v2127_v10 }
 0x5f7   : > { %3612 = vmatprep.mubr.f32.mxu1 %v2128_v7 }
 0x5f8   : > { %v3565_v40 = vpop.f32.mrb[56].mxu0 }
 0x5f9   : > { %v2132_v26 = vadd.f32 %v3565_v40, %v1947_v14  ;;  %v2091_v57 = vpop.f32.mrb[57].mxu0  ;;  %v2336_v14 = vld [vmem:[#allocation14 + $0x70] sm:$0xff] }
 0x5fa   : > { %v2130_v30 = vadd.f32 %v2091_v57, %v1945_v20  ;;  %v3566_v48 = vpop.f32.mrb[58].mxu0  ;;  %3613 = vmatmul.mubr.f32.gmra.mrb[56].mxu1 %v2129_v1  ;;  %v2337_v20 = vld [vmem:[#allocation14 + $0x78] sm:$0xff] }
 0x5fb   : > { %v2133_v17 = vadd.f32 %v3566_v48, %v1948_v16  ;;  %v2094_v11 = vpop.f32.mrb[59].mxu0  ;;  %v3933_v16 = vpack.c.bf16 %v2337_v20, %v2336_v14 }
 0x5fc   : > { %v2131_v22 = vadd.f32 %v2094_v11, %v1946_v38  ;;  %3615 = vmatprep.mubr.f32.mxu1 %v2130_v30  ;;  %v2958_v38 = vld [vmem:[%s5599_s26] ss:$0 sm:$0xff] }
 0x5fd   : > { %3934 = vmatprep.subr.bf16.mxu0 %v3933_v16 }
 0x5fe   : > { %3616 = vmatmul.mubr.f32.gmra.mrb[58].mxu1 %v2131_v22  ;;  %3936 = vmatpush3.bf16.msra.mxu0 %v3933_v16 }
 0x5ff   : > { %3618 = vmatprep.mubr.f32.mxu1 %v2132_v26  ;;  %3961 = vmatprep.subr.bf16.mxu0 %v4481_v32 }
 0x600   : > { %v3569_v0 = vpop.f32.mrb[60].mxu0 }
 0x601   : > { %v2136_v6 = vadd.f32 %v3569_v0, %v1951_v3  ;;  %v2107_v21 = vpop.f32.mrb[61].mxu0 }
 0x602   : > { %v2134_v35 = vadd.f32 %v2107_v21, %v1949_v24  ;;  %v3570_v29 = vpop.f32.mrb[62].mxu0  ;;  %3619 = vmatmul.mubr.f32.gmra.mrb[60].mxu1 %v2133_v17 }
 0x603   : > { %v2137_v23 = vadd.f32 %v3570_v29, %v1952_v5  ;;  %v2110_v13 = vpop.f32.mrb[63].mxu0 }
 0x604   : > { %v2135_v36 = vadd.f32 %v2110_v13, %v1950_v9  ;;  %3621 = vmatprep.mubr.f32.mxu1 %v2134_v35 }
 0x606   : > { %3622 = vmatmul.mubr.f32.gmra.mrb[62].mxu1 %v2135_v36 }
 0x607   : > { %3624 = vmatprep.mubr.f32.mxu1 %v2136_v6 }
 0x60a   : > { %3625 = vmatmul.mubr.f32.gmra.mrb[64].mxu1 %v2137_v23 }
 0x60b   : > { %3715 = vmatprep.mubr.msk.f32.mxu1 %vm4482_vm0, %v4483_v33 }
 0x6c1   : > { %v3605_v31 = vpop.f32.mrb[34].mxu1 }
 0x6c2   : > { %v2233_v3 = vadd.f32 %v3605_v31, %v2958_v38  ;;  %v2227_v34 = vpop.f32.mrb[35].mxu1 }
 0x6c3   : > { %v2228_v41 = vadd.f32 %v2958_v38, %v2227_v34 }
 0x6c4   : > { %v2307_v55 = vmax.f32 %v2233_v3, 0.0 }
 0x6c5   : > { %v2306_v24 = vmax.f32 %v2228_v41, 0.0  ;;  %v3608_v42 = vpop.f32.mrb[52].mxu1  ;;  %v2576_v41 = vld [vmem:[#allocation16] sm:$0xff] }
 0x6c6   : > { %v2243_v5 = vadd.f32 %v3608_v42, %v2958_v38  ;;  %v2237_v25 = vpop.f32.mrb[53].mxu1  ;;  %v2578_v42 = vld [vmem:[#allocation16 + $0x10] sm:$0xff] }
 0x6c7   : > { %v2238_v9 = vadd.f32 %v2958_v38, %v2237_v25  ;;  %3659 = vmatprep.mubr.f32.mxu0 %v2306_v24  ;;  %v2577_v24 = vld [vmem:[#allocation16 + $0x8] sm:$0xff] }
 0x6c8   : > { %3660 = vmatmul.mubr.f32.vlgmr.msra.gmra.mrb[64].mxu0 %v2307_v55  ;;  %v2309_v50 = vmax.f32 %v2243_v5, 0.0  ;;  %v3962_v55 = vpack.c.bf16 %v2577_v24, %v2576_v41  ;;  %v2579_v5 = vld [vmem:[#allocation16 + $0x18] sm:$0xff] }
 0x6c9   : > { %v2308_v37 = vmax.f32 %v2238_v9, 0.0  ;;  %v3611_v49 = vpop.f32.mrb[54].mxu1  ;;  %v3965_v25 = vpack.c.bf16 %v2579_v5, %v2578_v42  ;;  %v2580_v9 = vld [vmem:[#allocation16 + $0x20] sm:$0xff] }
 0x6ca   : > { %v2253_v12 = vadd.f32 %v3611_v49, %v2958_v38  ;;  %v2247_v44 = vpop.f32.mrb[55].mxu1  ;;  %3963 = vmatpush3.bf16.msra.mxu0 %v3962_v55  ;;  %v2582_v49 = vld [vmem:[#allocation16 + $0x30] sm:$0xff] }
 0x6cb   : > { %v2248_v61 = vadd.f32 %v2958_v38, %v2247_v44  ;;  %3662 = vmatprep.mubr.f32.mxu0 %v2308_v37  ;;  %3964 = vmatprep.subr.bf16.mxu0 %v4481_v32  ;;  %v2585_v44 = vld [vmem:[#allocation16 + $0x48] sm:$0xff] }
 0x6cc   : > { %3663 = vmatmul.mubr.f32.gmra.mrb[66].mxu0 %v2309_v50  ;;  %v2311_v53 = vmax.f32 %v2253_v12, 0.0  ;;  %v2583_v50 = vld [vmem:[#allocation16 + $0x38] sm:$0xff] }
 0x6cd   : > { %v2310_v27 = vmax.f32 %v2248_v61, 0.0  ;;  %v3614_v28 = vpop.f32.mrb[56].mxu1  ;;  %v3971_v12 = vpack.c.bf16 %v2583_v50, %v2582_v49 }
 0x6ce   : > { %v2263_v7 = vadd.f32 %v3614_v28, %v2958_v38  ;;  %v2257_v19 = vpop.f32.mrb[57].mxu1  ;;  %3966 = vmatpush3.bf16.msra.mxu0 %v3965_v25  ;;  %v2587_v28 = vld [vmem:[#allocation16 + $0x58] sm:$0xff] }
 0x6cf   : > { %v2258_v56 = vadd.f32 %v2958_v38, %v2257_v19  ;;  %3665 = vmatprep.mubr.f32.mxu0 %v2310_v27  ;;  %3967 = vmatprep.subr.bf16.mxu0 %v4481_v32  ;;  %v2586_v27 = vld [vmem:[#allocation16 + $0x50] sm:$0xff]  ;;  %v2589_v19 = vld [vmem:[#allocation16 + $0x68] sm:$0xff] }
 0x6d0   : > { %3666 = vmatmul.mubr.f32.gmra.mrb[68].mxu0 %v2311_v53  ;;  %v2313_v58 = vmax.f32 %v2263_v7, 0.0  ;;  %v3977_v53 = vpack.c.bf16 %v2587_v28, %v2586_v27  ;;  %v2588_v7 = vld [vmem:[#allocation16 + $0x60] sm:$0xff] }
 0x6d1   : > { %v2312_v8 = vmax.f32 %v2258_v56, 0.0  ;;  %v3617_v1 = vpop.f32.mrb[58].mxu1  ;;  %v3980_v56 = vpack.c.bf16 %v2589_v19, %v2588_v7 }
 0x6d2   : > { %v2273_v10 = vadd.f32 %v3617_v1, %v2958_v38  ;;  %v2267_v40 = vpop.f32.mrb[59].mxu1  ;;  %v2591_v1 = vld [vmem:[#allocation16 + $0x78] sm:$0xff] }
 0x6d3   : > { %v2268_v26 = vadd.f32 %v2958_v38, %v2267_v40  ;;  %3668 = vmatprep.mubr.f32.mxu0 %v2312_v8  ;;  %v2590_v8 = vld [vmem:[#allocation16 + $0x70] sm:$0xff] }
 0x6d4   : > { %3669 = vmatmul.mubr.f32.gmra.mrb[70].mxu0 %v2313_v58  ;;  %v2315_v48 = vmax.f32 %v2273_v10, 0.0  ;;  %v3983_v58 = vpack.c.bf16 %v2591_v1, %v2590_v8  ;;  %v5406_v10 = vld [vmem:[%s5600_s19] ss:$0 sm:$0xff] }
 0x6d5   : > { %v2314_v57 = vmax.f32 %v2268_v26, 0.0  ;;  %v3620_v30 = vpop.f32.mrb[60].mxu1 }
 0x6d6   : > { %v2283_v17 = vadd.f32 %v3620_v30, %v2958_v38  ;;  %v2277_v11 = vpop.f32.mrb[61].mxu1 }
 0x6d7   : > { %v2278_v22 = vadd.f32 %v2958_v38, %v2277_v11  ;;  %3671 = vmatprep.mubr.f32.mxu0 %v2314_v57 }
 0x6d8   : > { %3672 = vmatmul.mubr.f32.gmra.mrb[72].mxu0 %v2315_v48  ;;  %v2317_v21 = vmax.f32 %v2283_v17, 0.0 }
 0x6d9   : > { %v2316_v0 = vmax.f32 %v2278_v22, 0.0  ;;  %v3623_v6 = vpop.f32.mrb[62].mxu1 }
 0x6da   : > { %v2293_v35 = vadd.f32 %v3623_v6, %v2958_v38  ;;  %v2287_v29 = vpop.f32.mrb[63].mxu1 }
 0x6db   : > { %v2288_v23 = vadd.f32 %v2958_v38, %v2287_v29  ;;  %3674 = vmatprep.mubr.f32.mxu0 %v2316_v0 }
 0x6dc   : > { %3675 = vmatmul.mubr.f32.gmra.mrb[74].mxu0 %v2317_v21  ;;  %v2319_v14 = vmax.f32 %v2293_v35, 0.0 }
 0x6dd   : > { %v2318_v13 = vmax.f32 %v2288_v23, 0.0  ;;  %v3626_v36 = vpop.f32.mrb[64].mxu1 }
 0x6de   : > { %v2303_v20 = vadd.f32 %v3626_v36, %v2958_v38  ;;  %v2297_v16 = vpop.f32.mrb[65].mxu1 }
 0x6df   : > { %v2298_v31 = vadd.f32 %v2958_v38, %v2297_v16  ;;  %3677 = vmatprep.mubr.f32.mxu0 %v2318_v13  ;;  %v2581_v38 = vld [vmem:[#allocation16 + $0x28] sm:$0xff] }
 0x6e0   : > { %3678 = vmatmul.mubr.f32.gmra.mrb[76].mxu0 %v2319_v14  ;;  %v2321_v34 = vmax.f32 %v2303_v20, 0.0  ;;  %v3968_v37 = vpack.c.bf16 %v2581_v38, %v2580_v9 }
 0x6e1   : > { %v2320_v3 = vmax.f32 %v2298_v31, 0.0 }
 0x6e2   : > { %3969 = vmatpush3.bf16.msra.mxu0 %v3968_v37 }
 0x6e3   : > { %3680 = vmatprep.mubr.f32.mxu0 %v2320_v3  ;;  %3970 = vmatprep.subr.bf16.mxu0 %v4481_v32 }
 0x6e4   : > { %3681 = vmatmul.mubr.f32.gmra.mrb[78].mxu0 %v2321_v34 }
 0x6e5   : > { %3750 = vmatprep.mubr.msk.f32.mxu0 %vm4482_vm0, %v4483_v33  ;;  %v2584_v33 = vld [vmem:[#allocation16 + $0x40] sm:$0xff] }
 0x6e6   : > { %3972 = vmatpush3.bf16.msra.mxu0 %v3971_v12  ;;  %v3974_v61 = vpack.c.bf16 %v2585_v44, %v2584_v33 }
 0x6e7   : > { %3973 = vmatprep.subr.bf16.mxu0 %v4481_v32 }
 0x6ea   : > { %3975 = vmatpush3.bf16.msra.mxu0 %v3974_v61 }
 0x6eb   : > { %3976 = vmatprep.subr.bf16.mxu0 %v4481_v32 }
 0x6ee   : > { %3978 = vmatpush3.bf16.msra.mxu0 %v3977_v53 }
 0x6ef   : > { %3979 = vmatprep.subr.bf16.mxu0 %v4481_v32 }
 0x6f2   : > { %3981 = vmatpush3.bf16.msra.mxu0 %v3980_v56 }
 0x6f3   : > { %3982 = vmatprep.subr.bf16.mxu0 %v4481_v32 }
 0x6f6   : > { %3984 = vmatpush3.bf16.msra.mxu0 %v3983_v58  ;;  %v2960_v58 = vld [vmem:[%s5602_s6] ss:$0 sm:$0xff] }
 0x79b   : > { %v3661_v40 = vpop.f32.mrb[64].mxu0 }
 0x79c   : > { %v2417_v26 = vadd.f32 %v3661_v40, %v5406_v10  ;;  %v2411_v57 = vpop.f32.mrb[65].mxu0 }
 0x79d   : > { %v2412_v30 = vadd.f32 %v5406_v10, %v2411_v57 }
 0x79e   : > { %v2491_v48 = vadd.f32 %v2417_v26, %v5238_v45 }
 0x79f   : > { %v2490_v17 = vadd.f32 %v2412_v30, %v5241_v51  ;;  %v3664_v11 = vpop.f32.mrb[66].mxu0 }
 0x7a0   : > { %v2427_v22 = vadd.f32 %v3664_v11, %v5406_v10  ;;  %v2421_v0 = vpop.f32.mrb[67].mxu0 }
 0x7a1   : > { %v3938_v6 = vpack.c.bf16 %v2491_v48, %v2490_v17  ;;  %v2422_v21 = vadd.f32 %v5406_v10, %v2421_v0 }
 0x7a2   : > { %v2493_v35 = vadd.f32 %v2427_v22, %v5248_v60 }
 0x7a3   : > { %v2492_v29 = vadd.f32 %v2422_v21, %v5251_v46  ;;  %v3667_v23 = vpop.f32.mrb[68].mxu0  ;;  %3939 = vmatpush3.bf16.msra.mxu1 %v3938_v6 }
 0x7a4   : > { %v2437_v13 = vadd.f32 %v3667_v23, %v5406_v10  ;;  %v2431_v36 = vpop.f32.mrb[69].mxu0  ;;  %3940 = vmatprep.subr.bf16.mxu1 %v4481_v32 }
 0x7a5   : > { %v3941_v45 = vpack.c.bf16 %v2493_v35, %v2492_v29  ;;  %v2432_v51 = vadd.f32 %v5406_v10, %v2431_v36 }
 0x7a6   : > { %v2495_v14 = vadd.f32 %v2437_v13, %v5260_v54 }
 0x7a7   : > { %v2494_v20 = vadd.f32 %v2432_v51, %v5263_v4  ;;  %v3670_v16 = vpop.f32.mrb[70].mxu0  ;;  %3942 = vmatpush3.bf16.msra.mxu1 %v3941_v45 }
 0x7a8   : > { %v2447_v60 = vadd.f32 %v3670_v16, %v5406_v10  ;;  %v2441_v31 = vpop.f32.mrb[71].mxu0  ;;  %3943 = vmatprep.subr.bf16.mxu1 %v4481_v32 }
 0x7a9   : > { %v3944_v46 = vpack.c.bf16 %v2495_v14, %v2494_v20  ;;  %v2442_v3 = vadd.f32 %v5406_v10, %v2441_v31 }
 0x7aa   : > { %v2497_v34 = vadd.f32 %v2447_v60, %v5272_v15 }
 0x7ab   : > { %v2496_v41 = vadd.f32 %v2442_v3, %v5275_v18  ;;  %v3673_v24 = vpop.f32.mrb[72].mxu0  ;;  %3945 = vmatpush3.bf16.msra.mxu1 %v3944_v46 }
 0x7ac   : > { %v2457_v54 = vadd.f32 %v3673_v24, %v5406_v10  ;;  %v2451_v42 = vpop.f32.mrb[73].mxu0  ;;  %3946 = vmatprep.subr.bf16.mxu1 %v4481_v32 }
 0x7ad   : > { %v3947_v4 = vpack.c.bf16 %v2497_v34, %v2496_v41  ;;  %v2452_v55 = vadd.f32 %v5406_v10, %v2451_v42 }
 0x7ae   : > { %v2499_v5 = vadd.f32 %v2457_v54, %v5284_v62 }
 0x7af   : > { %v2498_v25 = vadd.f32 %v2452_v55, %v5287_v63  ;;  %v3676_v9 = vpop.f32.mrb[74].mxu0  ;;  %3948 = vmatpush3.bf16.msra.mxu1 %v3947_v4 }
 0x7b0   : > { %v2467_v15 = vadd.f32 %v3676_v9, %v5406_v10  ;;  %v2461_v38 = vpop.f32.mrb[75].mxu0  ;;  %3949 = vmatprep.subr.bf16.mxu1 %v4481_v32 }
 0x7b1   : > { %v3950_v18 = vpack.c.bf16 %v2499_v5, %v2498_v25  ;;  %v2462_v37 = vadd.f32 %v5406_v10, %v2461_v38 }
 0x7b2   : > { %v2501_v49 = vadd.f32 %v2467_v15, %v5296_v39 }
 0x7b3   : > { %v2500_v50 = vadd.f32 %v2462_v37, %v5300_v43  ;;  %v3679_v12 = vpop.f32.mrb[76].mxu0  ;;  %3951 = vmatpush3.bf16.msra.mxu1 %v3950_v18 }
 0x7b4   : > { %v2477_v62 = vadd.f32 %v3679_v12, %v5406_v10  ;;  %v2471_v33 = vpop.f32.mrb[77].mxu0  ;;  %3952 = vmatprep.subr.bf16.mxu1 %v4481_v32 }
 0x7b5   : > { %v3953_v63 = vpack.c.bf16 %v2501_v49, %v2500_v50  ;;  %v2472_v44 = vadd.f32 %v5406_v10, %v2471_v33 }
 0x7b6   : > { %v2503_v61 = vadd.f32 %v2477_v62, %v5310_v47 }
 0x7b7   : > { %v2502_v27 = vadd.f32 %v2472_v44, %v5314_v59  ;;  %v3682_v28 = vpop.f32.mrb[78].mxu0  ;;  %3954 = vmatpush3.bf16.msra.mxu1 %v3953_v63  ;;  %v4125_v59 = vld [vmem:[%s5131_s20] sm:$0xff]  ;;  %s5603_s20 = sld [smem:[#allocation42_spill]] }
 0x7b8   : > { %v2487_v39 = vadd.f32 %v3682_v28, %v5406_v10  ;;  %v2481_v43 = vpop.f32.mrb[79].mxu0  ;;  %3955 = vmatprep.subr.bf16.mxu1 %v4481_v32 }
 0x7b9   : > { %v3956_v53 = vpack.c.bf16 %v2503_v61, %v2502_v27  ;;  %v2482_v7 = vadd.f32 %v5406_v10, %v2481_v43 }
 0x7ba   : > { %v2505_v19 = vadd.f32 %v2487_v39, %v5329_v2 }
 0x7bb   : > { %v2504_v56 = vadd.f32 %v2482_v7, %v5331_v52  ;;  %3957 = vmatpush3.bf16.msra.mxu1 %v3956_v53 }
 0x7bc   : > { %3958 = vmatprep.subr.bf16.mxu1 %v4481_v32 }
 0x7bd   : > { %v3959_v47 = vpack.c.bf16 %v2505_v19, %v2504_v56  ;;  %s5456_s9 = scalar_lea.hbm %s5603_s20, %s2962_s12 }
 0x7bf   : > { %3960 = vmatpush3.bf16.msra.mxu1 %v3959_v47 }
 0x7c2   : > { %3716 = vmatmul.mubr.f32.vlgmr.msra.gmra.mrb[66].mxu1 %v4125_v59 }
 0x895   : > { %v2572_v8 = vpop.f32.mrb[66].mxu1 }
 0x896   : > { %v3717_v1 = vpop.f32.mrb[67].mxu1  ;;  %3751 = vmatmul.mubr.f32.vlgmr.msra.gmra.mrb[80].mxu0 %v2572_v8 }
 0x969   : > { %v2665_v2 = vpop.f32.mrb[80].mxu0 }
 0x96a   : > { %v2666_v52 = vadd.f32 %v2960_v58, %v2665_v2  ;;  %v3752_v32 = vpop.f32.mrb[81].mxu0 }
 0x96c   : > { %2669 = vst [vmem:[%s773_s13] sm:$0xff] %v2666_v52 }
 0x96d   : > { %4397 = shalt.err (!%p4394_p6)
}
 0x96e   : > { %s4398_s23 = scalar_lea.hbm %s5456_s9, 128  ;;  %s4402_s7 = scalar_lea.hbm %s5603_s20, 256 }
 0x96f   : > { %p4399_p13 = scmp.ne.s32.totalorder %s5456_s9, %s4398_s23  ;;  %p4403_p11 = scmp.lt.u32.totalorder %s5456_s9, %s5603_s20 }
 0x970   : > { %p4404_p3 = scmp.lt.u32.totalorder %s4402_s7, %s4398_s23  ;;  %p4406_p0 = scmp.lt.u32.totalorder %s4398_s23, %s5456_s9 }
 0x971   : > { %p4400_p5 = pnand %p4399_p13, %p5604_p8 }
 0x972   : > { %p4405_p2 = por %p4404_p3, %p4403_p11 }
 0x973   : > { %p4401_p9 = pneg %p4400_p5 }
 0x974   : > { %p4407_p4 = por %p4406_p0, %p4405_p2 }
 0x976   : > { %p4408_p7 = pnand %p4407_p4, %p4401_p9 }
 0x978   : > { %4411 = shalt.err (!%p4408_p7)
}
 0x979   : > { %4015 = dma.vmem_to_hbm [thread:$0]  (%p5604_p8), %s5458_s22, 128, %s5456_s9, %s2671_s30  }
 0x97a PF: > { %s5605_s29 = sld [smem:[#allocation24_spill]]  ;;  %s5606_s24 = sld [smem:[#allocation29_spill]] }
 0x97b   : > { %p5608_p1 = scmp.ge.s32.totalorder %s4466_s27, 2 }
 0x980   : > { %s2696_s28 = sand.u32 1, %s5605_s29   ;;  %p5607_p12 = scmp.ne.s32.totalorder %s5606_s24, 0 }
 0x981   : > { %s2697_s6 = scalar_lea.sflag [#allocation4], %s2696_s28 }
 0x982   : > { %p4047_p10 = pnand %p5608_p1, %p5607_p12 }
 0x984   : > { %4449 = dma.done.wait (!%p4047_p10), %s2697_s6, 128  }
 0x985   : > { %4451 = vsyncadd (!%p4047_p10), %s2697_s6, 4294967168  ;;  %s5609_s27 = sld [smem:[#allocation26_spill]]  ;;  %s5610_s12 = sld [smem:[#allocation25_spill]] }
 0x986   : > { %s5611_s26 = sld [smem:[#allocation27_spill]]  ;;  %s5612_s24 = smov %s4458_s25 }
 0x98b   : > { %p36_p6 = scmp.ge.s32.totalorder %s5609_s27, 4   ;;  %s5613_s25 = smov %s5610_s12 }
 0x98d   :  { %38 = sbr.rel (!%p36_p6) target bundleno = 24 (0x18), region = 190 }
 0x994   :  { %2702 = vsyncpa [#allocation3], 1 }
 0x995   :  { %2704 = vsyncpa [#allocation3 + $0x1], 1 }
 0x996   :  { %2705 = vsyncpa [#allocation6], 1 }
 0x997   :  { %2707 = vsyncpa [#allocation6 + $0x1], 1 }
 0x998   :  { %2708 = vsyncpa [#allocation9], 1 }
 0x999   :  { %2709 = vsyncpa [#allocation12], 1 }
 0x99a   :  { %2710 = vsyncpa [#allocation15], 1 }
 0x99b   :  { %2711 = vsyncpa [#allocation4], 1 }
 0x99c   :  { %2713 = vsyncpa [#allocation4 + $0x1], 1 }

</bundles_post_ra>
